<compile_context>
chip_gen: v7x
topology: tpu7x:2x2x1
jax: 0.10.0
libtpu: 0.0.40
codegen_flags: <defaults>
</compile_context>

<pallas_src>
import functools
import math

import jax
import jax.numpy as jnp
from jax import lax
from jax.experimental import pallas as pl
from jax.experimental.pallas import tpu as pltpu

# ---------------- Config (small synthetic BERT) ----------------
VOCAB_SIZE = 128
HIDDEN_SIZE = 32            # Config.HIDDEN_SIZE
NUM_LAYERS = 2
NUM_HEADS = 2
HEAD_DIM = HIDDEN_SIZE // NUM_HEADS
INTERMEDIATE_SIZE = 64
MAX_POS = 16
TYPE_VOCAB = 2
NUM_CLASSES = 4
LANE = 128                  # lane-dense output / bias-slab width

LN_EPS = 1e-12
ATTN_SCALE = 1.0 / math.sqrt(HEAD_DIM)
NEG_INF = -1e9              # plain Python float (NOT jnp scalar) -> no captured constant
MAX_BLOCK_BATCH = 16        # max sequences fused per grid step
# Config.DROPOUT: nn.Dropout is identity at inference time (eval mode).
# TODO(synk): stochastic dropout not applied (inference semantics).

# ---- bias / LN vector slab row layout ----
_R_EMB_G, _R_EMB_B = 0, 1
_R_LAYER0, _R_PER_LAYER = 2, 8
# per-layer row offsets: 0 qkv_b | 1 ao_b | 2 ln1_g | 3 ln1_b | 4 fi_b | 5 fo_b | 6 ln2_g | 7 ln2_b
_R_POOLER_B = _R_LAYER0 + NUM_LAYERS * _R_PER_LAYER
_R_CLS_B = _R_POOLER_B + 1


# ---------------- In-kernel helpers ----------------

def _layer_norm(x, g, b):
    mean = jnp.mean(x, axis=-1, keepdims=True)
    var = jnp.mean((x - mean) ** 2, axis=-1, keepdims=True)
    return (x - mean) * lax.rsqrt(var + LN_EPS) * g + b


# ---------------- Fused forward kernel (one grid step = `bt` sequences) ----------------

def _fused_forward_kernel(ids_ref, mask_ref, word_emb_ref, pos_type_ref, vecs_ref,
                          qkv_w_ref, ao_w_ref, fi_w_ref, fo_w_ref,
                          pooler_w_ref, cls_w_ref, out_ref, *, bt, seq_len):
    Bt, S, H = bt, seq_len, HIDDEN_SIZE
    N = Bt * S

    vecs = vecs_ref[...]                                   # [rows, 128] bias/LN slab
    vrow = lambda r, w: vecs[r:r + 1, :w]                  # static row/lane slice

    # --- Embeddings: one-hot matmul gather over all Bt*S tokens at once ---
    ids = ids_ref[...].reshape(N, 1)                       # [N, 1] int32
    one_hot = (ids == lax.broadcasted_iota(jnp.int32, (N, VOCAB_SIZE), 1)
               ).astype(jnp.float32)                       # [N, VOCAB]
    h = jnp.dot(one_hot, word_emb_ref[...], preferred_element_type=jnp.float32)
    h = (h.reshape(Bt, S, H) + pos_type_ref[...][None]).reshape(N, H)
    h = _layer_norm(h, vrow(_R_EMB_G, H), vrow(_R_EMB_B, H))

    mask = mask_ref[...]                                   # [Bt, 1, S]  (1=keep, 0=pad)
    attn_bias = (1.0 - mask) * NEG_INF                     # per-sequence additive key mask

    # --- Encoder layers (Python-unrolled; big matmuls on flattened [Bt*S, ...]) ---
    for l in range(NUM_LAYERS):
        base = _R_LAYER0 + l * _R_PER_LAYER
        qkv_w = qkv_w_ref[l]                               # [H, 3H]
        ao_w = ao_w_ref[l]                                 # [H, H]
        fi_w = fi_w_ref[l]                                 # [H, I]
        fo_w = fo_w_ref[l]                                 # [I, H]

        # Fused Q|K|V projection: one MXU matmul, [N, H] x [H, 3H].
        qkv = (jnp.dot(h, qkv_w, preferred_element_type=jnp.float32)
               + vrow(base + 0, 3 * H))                    # [N, 3H]

        # Attention: batched over the Bt sequences (no cross-sequence mixing),
        # short Python loop over the 2 heads, contexts concatenated so the output
        # projection is a single [N, H] x [H, H] matmul.
        ctx_parts = []
        for hd in range(NUM_HEADS):
            lo = hd * HEAD_DIM
            qh = qkv[:, lo:lo + HEAD_DIM].reshape(Bt, S, HEAD_DIM)
            kh = qkv[:, H + lo:H + lo + HEAD_DIM].reshape(Bt, S, HEAD_DIM)
            vh = qkv[:, 2 * H + lo:2 * H + lo + HEAD_DIM].reshape(Bt, S, HEAD_DIM)

            s = jnp.einsum('bqd,bkd->bqk', qh, kh,
                           preferred_element_type=jnp.float32) * ATTN_SCALE
            s = s + attn_bias                              # mask keys, per sequence
            s = s - jnp.max(s, axis=-1, keepdims=True)
            p = jnp.exp(s)
            p = p * pl.reciprocal(jnp.sum(p, axis=-1, keepdims=True), approx=True)
            ctx = jnp.einsum('bqk,bkd->bqd', p, vh,
                             preferred_element_type=jnp.float32)   # [Bt, S, Dh]
            ctx_parts.append(ctx.reshape(N, HEAD_DIM))

        ctx_all = jnp.concatenate(ctx_parts, axis=1)        # [N, H]
        attn = (jnp.dot(ctx_all, ao_w, preferred_element_type=jnp.float32)
                + vrow(base + 1, H))
        h = _layer_norm(attn + h, vrow(base + 2, H), vrow(base + 3, H))

        inter = (jnp.dot(h, fi_w, preferred_element_type=jnp.float32)
                 + vrow(base + 4, INTERMEDIATE_SIZE))
        # TODO(synk): HF BERT uses erf-GELU; tanh approximation kept for guaranteed lowering.
        inter = jax.nn.gelu(inter, approximate=True)
        ffn = (jnp.dot(inter, fo_w, preferred_element_type=jnp.float32)
               + vrow(base + 5, H))
        h = _layer_norm(ffn + h, vrow(base + 6, H), vrow(base + 7, H))

    # --- Pooler (tanh on [CLS]) + classifier head, batched over all Bt sequences ---
    cls_tok = h.reshape(Bt, S, H)[:, 0, :]                  # [Bt, H]
    pooled = jnp.tanh(jnp.dot(cls_tok, pooler_w_ref[...],
                              preferred_element_type=jnp.float32)
                      + vrow(_R_POOLER_B, H))
    # self.dropout: identity at inference.
    logits = (jnp.dot(pooled, cls_w_ref[...],               # cls_w lane-padded to 128
                      preferred_element_type=jnp.float32)
              + vecs[_R_CLS_B:_R_CLS_B + 1, :])              # [Bt, 128] lane-dense
    out_ref[...] = logits.reshape(Bt, 1, LANE)


# ---------------- Parameter packing (few packed slabs instead of 32 tiny refs) ----------------

def _pack_params(params, seq_len):
    pos_type = params["pos_emb"][:seq_len] + params["type_emb"][0][None, :]   # [S, H]

    def row(v):
        v = v.reshape(1, -1)
        return jnp.pad(v, ((0, 0), (0, LANE - v.shape[1])))

    rows = [row(params["emb_ln_g"]), row(params["emb_ln_b"])]
    qkv_w, ao_w, fi_w, fo_w = [], [], [], []
    for l in params["layers"]:
        qkv_w.append(jnp.concatenate([l["q_w"], l["k_w"], l["v_w"]], axis=1))   # [H, 3H]
        ao_w.append(l["attn_out_w"])
        fi_w.append(l["ffn_in_w"])
        fo_w.append(l["ffn_out_w"])
        rows += [row(jnp.concatenate([l["q_b"], l["k_b"], l["v_b"]])),
                 row(l["attn_out_b"]),
                 row(l["ln1_g"]), row(l["ln1_b"]),
                 row(l["ffn_in_b"]), row(l["ffn_out_b"]),
                 row(l["ln2_g"]), row(l["ln2_b"])]
    rows += [row(params["pooler_b"]), row(params["cls_b"])]

    vecs = jnp.concatenate(rows, axis=0)                    # [20, 128]
    pad_rows = (-vecs.shape[0]) % 8
    if pad_rows:
        vecs = jnp.pad(vecs, ((0, pad_rows), (0, 0)))       # sublane-pad to multiple of 8

    cls_w_pad = jnp.pad(params["cls_w"], ((0, 0), (0, LANE - NUM_CLASSES)))  # [H, 128]

    return [params["word_emb"], pos_type, vecs,
            jnp.stack(qkv_w), jnp.stack(ao_w), jnp.stack(fi_w), jnp.stack(fo_w),
            params["pooler_w"], cls_w_pad]


# ---------------- Forward pass (NewsClassifier_base.forward) ----------------

@jax.jit
def news_classifier_forward(params, input_ids, attention_mask):
    B, S = input_ids.shape
    # Sequences fused per grid step: fill MXU rows, but keep >= 2 grid steps whenever
    # B >= 2 so both v7x TensorCores get work under dimension_semantics=("parallel",).
    bt = max(1, min(MAX_BLOCK_BATCH, -(-B // 2)))
    b_pad = -(-B // bt) * bt
    if b_pad != B:
        input_ids = jnp.pad(input_ids, ((0, b_pad - B), (0, 0)))
        attention_mask = jnp.pad(attention_mask, ((0, b_pad - B), (0, 0)))

    weights = _pack_params(params, S)
    ids3 = input_ids.astype(jnp.int32).reshape(b_pad, S, 1)
    mask3 = attention_mask.astype(jnp.float32).reshape(b_pad, 1, S)

    kernel = functools.partial(_fused_forward_kernel, bt=bt, seq_len=S)
    # Weights: full-array blocks, constant index maps -> VMEM-resident across grid steps.
    weight_specs = [pl.BlockSpec(w.shape, lambda b, _n=w.ndim: (0,) * _n) for w in weights]

    out = pl.pallas_call(
        kernel,
        out_shape=jax.ShapeDtypeStruct((b_pad, 1, LANE), jnp.float32),
        grid=(b_pad // bt,),
        in_specs=[pl.BlockSpec((bt, S, 1), lambda b: (b, 0, 0)),    # input_ids block
                  pl.BlockSpec((bt, 1, S), lambda b: (b, 0, 0))     # attention_mask block
                  ] + weight_specs,
        out_specs=pl.BlockSpec((bt, 1, LANE), lambda b: (b, 0, 0)), # lane-dense logits
        compiler_params=pltpu.CompilerParams(dimension_semantics=("parallel",)),
    )(ids3, mask3, *weights)
    return out[:B, 0, :NUM_CLASSES]


# ---------------- Deterministic parameter init ----------------

def init_params(key):
    def normal(k, shape):
        return 0.02 * jax.random.normal(k, shape, jnp.float32)

    keys = iter(jax.random.split(key, 256))
    p = {
        "word_emb": normal(next(keys), (VOCAB_SIZE, HIDDEN_SIZE)),
        "pos_emb": normal(next(keys), (MAX_POS, HIDDEN_SIZE)),
        "type_emb": normal(next(keys), (TYPE_VOCAB, HIDDEN_SIZE)),
        "emb_ln_g": jnp.ones((HIDDEN_SIZE,), jnp.float32),
        "emb_ln_b": jnp.zeros((HIDDEN_SIZE,), jnp.float32),
    }
    layers = []
    for _ in range(NUM_LAYERS):
        l = {}
        for name in ("q", "k", "v", "attn_out"):
            l[f"{name}_w"] = normal(next(keys), (HIDDEN_SIZE, HIDDEN_SIZE))
            l[f"{name}_b"] = jnp.zeros((HIDDEN_SIZE,), jnp.float32)
        l["ln1_g"] = jnp.ones((HIDDEN_SIZE,), jnp.float32)
        l["ln1_b"] = jnp.zeros((HIDDEN_SIZE,), jnp.float32)
        l["ffn_in_w"] = normal(next(keys), (HIDDEN_SIZE, INTERMEDIATE_SIZE))
        l["ffn_in_b"] = jnp.zeros((INTERMEDIATE_SIZE,), jnp.float32)
        l["ffn_out_w"] = normal(next(keys), (INTERMEDIATE_SIZE, HIDDEN_SIZE))
        l["ffn_out_b"] = jnp.zeros((HIDDEN_SIZE,), jnp.float32)
        l["ln2_g"] = jnp.ones((HIDDEN_SIZE,), jnp.float32)
        l["ln2_b"] = jnp.zeros((HIDDEN_SIZE,), jnp.float32)
        layers.append(l)
    p["layers"] = layers
    p["pooler_w"] = normal(next(keys), (HIDDEN_SIZE, HIDDEN_SIZE))
    p["pooler_b"] = jnp.zeros((HIDDEN_SIZE,), jnp.float32)
    p["cls_w"] = normal(next(keys), (HIDDEN_SIZE, NUM_CLASSES))
    p["cls_b"] = jnp.zeros((NUM_CLASSES,), jnp.float32)
    return p


if __name__ == "__main__":
    key = jax.random.PRNGKey(0)
    pkey, ikey = jax.random.split(key)
    params = init_params(pkey)

    B, S = 8, 8            # bt = 4 sequences per grid step -> grid = (2,)
    input_ids = jax.random.randint(ikey, (B, S), 0, VOCAB_SIZE, dtype=jnp.int32)
    attention_mask = jnp.ones((B, S), dtype=jnp.int32)
    attention_mask = attention_mask.at[1, 6:].set(0).at[5, 4:].set(0)   # padded tails

    logits = news_classifier_forward(params, input_ids, attention_mask)
    jax.block_until_ready(logits)
    assert logits.shape == (B, NUM_CLASSES)
    assert bool(jnp.all(jnp.isfinite(logits)))
    print("KERNEL_OK")
</pallas_src>

<mosaic_0001>
module attributes {stable_mosaic.version = 11 : i64} {
  func.func @_fused_forward_kernel(%arg0: i32, %arg1: memref<4x8x1xi32, #tpu.memory_space<vmem>>, %arg2: memref<4x1x8xf32, #tpu.memory_space<vmem>>, %arg3: memref<128x32xf32, #tpu.memory_space<vmem>>, %arg4: memref<8x32xf32, #tpu.memory_space<vmem>>, %arg5: memref<24x128xf32, #tpu.memory_space<vmem>>, %arg6: memref<2x32x96xf32, #tpu.memory_space<vmem>>, %arg7: memref<2x32x32xf32, #tpu.memory_space<vmem>>, %arg8: memref<2x32x64xf32, #tpu.memory_space<vmem>>, %arg9: memref<2x64x32xf32, #tpu.memory_space<vmem>>, %arg10: memref<32x32xf32, #tpu.memory_space<vmem>>, %arg11: memref<32x128xf32, #tpu.memory_space<vmem>>, %arg12: memref<4x1x128xf32, #tpu.memory_space<vmem>>) attributes {dimension_semantics = [#tpu.dimension_semantics<parallel>], iteration_bounds = array<i64: 2>, scalar_prefetch = 0 : i64, scratch_operands = 0 : i64, tpu.core_type = #tpu.core_type<tc>, window_params = [{transform_indices = @transform_0, window_bounds = array<i64: 4, 8, 1>}, {transform_indices = @transform_1, window_bounds = array<i64: 4, 1, 8>}, {pipeline_mode = #tpu.pipeline_mode<synchronous>, transform_indices = @transform_2, window_bounds = array<i64: 128, 32>}, {pipeline_mode = #tpu.pipeline_mode<synchronous>, transform_indices = @transform_3, window_bounds = array<i64: 8, 32>}, {pipeline_mode = #tpu.pipeline_mode<synchronous>, transform_indices = @transform_4, window_bounds = array<i64: 24, 128>}, {pipeline_mode = #tpu.pipeline_mode<synchronous>, transform_indices = @transform_5, window_bounds = array<i64: 2, 32, 96>}, {pipeline_mode = #tpu.pipeline_mode<synchronous>, transform_indices = @transform_6, window_bounds = array<i64: 2, 32, 32>}, {pipeline_mode = #tpu.pipeline_mode<synchronous>, transform_indices = @transform_7, window_bounds = array<i64: 2, 32, 64>}, {pipeline_mode = #tpu.pipeline_mode<synchronous>, transform_indices = @transform_8, window_bounds = array<i64: 2, 64, 32>}, {pipeline_mode = #tpu.pipeline_mode<synchronous>, transform_indices = @transform_9, window_bounds = array<i64: 32, 32>}, {pipeline_mode = #tpu.pipeline_mode<synchronous>, transform_indices = @transform_10, window_bounds = array<i64: 32, 128>}, {transform_indices = @transform_11, window_bounds = array<i64: 4, 1, 128>}]} {
    %c0 = arith.constant 0 : index
    %c0_0 = arith.constant 0 : index
    %0 = vector.load %arg5[%c0, %c0_0] : memref<24x128xf32, #tpu.memory_space<vmem>>, vector<24x128xf32>
    %c0_1 = arith.constant 0 : index
    %c0_2 = arith.constant 0 : index
    %c0_3 = arith.constant 0 : index
    %1 = vector.load %arg1[%c0_1, %c0_2, %c0_3] : memref<4x8x1xi32, #tpu.memory_space<vmem>>, vector<4x8x1xi32>
    %2 = vector.shape_cast %1 : vector<4x8x1xi32> to vector<32x1xi32>
    %3 = tpu.iota {dimensions = array<i32: 1>} : vector<32x128xi32>
    %4 = vector.broadcast %2 : vector<32x1xi32> to vector<32x128xi32>
    %5 = arith.cmpi eq, %4, %3 : vector<32x128xi32>
    %6 = arith.extui %5 : vector<32x128xi1> to vector<32x128xi32>
    %7 = arith.sitofp %6 : vector<32x128xi32> to vector<32x128xf32>
    %c0_4 = arith.constant 0 : index
    %c0_5 = arith.constant 0 : index
    %8 = vector.load %arg3[%c0_4, %c0_5] : memref<128x32xf32, #tpu.memory_space<vmem>>, vector<128x32xf32>
    %cst = arith.constant dense<0.000000e+00> : vector<32x32xf32>
    %9 = tpu.matmul %7, %8, %cst {dimension_numbers = #tpu.dot_dimension_numbers<[1], [0], [0], [1], [0, 0, 1, 1], [], []>} : vector<32x128xf32>, vector<128x32xf32>, vector<32x32xf32> -> vector<32x32xf32>
    %10 = vector.shape_cast %9 : vector<32x32xf32> to vector<4x8x32xf32>
    %c0_6 = arith.constant 0 : index
    %c0_7 = arith.constant 0 : index
    %11 = vector.load %arg4[%c0_6, %c0_7] : memref<8x32xf32, #tpu.memory_space<vmem>>, vector<8x32xf32>
    %12 = vector.shape_cast %11 : vector<8x32xf32> to vector<1x8x32xf32>
    %13 = vector.broadcast %12 : vector<1x8x32xf32> to vector<4x8x32xf32>
    %14 = arith.addf %10, %13 : vector<4x8x32xf32>
    %15 = vector.shape_cast %14 : vector<4x8x32xf32> to vector<32x32xf32>
    %16 = vector.extract_strided_slice %0 {offsets = [0, 0], sizes = [1, 32], strides = [1, 1]} : vector<24x128xf32> to vector<1x32xf32>
    %17 = vector.extract_strided_slice %0 {offsets = [1, 0], sizes = [1, 32], strides = [1, 1]} : vector<24x128xf32> to vector<1x32xf32>
    %cst_8 = arith.constant dense<0.000000e+00> : vector<32xf32>
    %18 = vector.multi_reduction <add>, %15, %cst_8 [1] : vector<32x32xf32> to vector<32xf32>
    %19 = vector.shape_cast %18 : vector<32xf32> to vector<32x1xf32>
    %cst_9 = arith.constant 3.200000e+01 : f32
    %20 = vector.broadcast %cst_9 : f32 to vector<32x1xf32>
    %21 = arith.divf %19, %20 : vector<32x1xf32>
    %22 = vector.broadcast %21 : vector<32x1xf32> to vector<32x32xf32>
    %23 = arith.subf %15, %22 : vector<32x32xf32>
    %24 = arith.mulf %23, %23 : vector<32x32xf32>
    %cst_10 = arith.constant dense<0.000000e+00> : vector<32xf32>
    %25 = vector.multi_reduction <add>, %24, %cst_10 [1] : vector<32x32xf32> to vector<32xf32>
    %26 = vector.shape_cast %25 : vector<32xf32> to vector<32x1xf32>
    %cst_11 = arith.constant 3.200000e+01 : f32
    %27 = vector.broadcast %cst_11 : f32 to vector<32x1xf32>
    %28 = arith.divf %26, %27 : vector<32x1xf32>
    %29 = vector.broadcast %21 : vector<32x1xf32> to vector<32x32xf32>
    %30 = arith.subf %15, %29 : vector<32x32xf32>
    %cst_12 = arith.constant 9.99999996E-13 : f32
    %31 = vector.broadcast %cst_12 : f32 to vector<32x1xf32>
    %32 = arith.addf %28, %31 : vector<32x1xf32>
    %33 = math.rsqrt %32 : vector<32x1xf32>
    %34 = vector.broadcast %33 : vector<32x1xf32> to vector<32x32xf32>
    %35 = arith.mulf %30, %34 : vector<32x32xf32>
    %36 = vector.broadcast %16 : vector<1x32xf32> to vector<32x32xf32>
    %37 = arith.mulf %35, %36 : vector<32x32xf32>
    %38 = vector.broadcast %17 : vector<1x32xf32> to vector<32x32xf32>
    %39 = arith.addf %37, %38 : vector<32x32xf32>
    %c0_13 = arith.constant 0 : index
    %c0_14 = arith.constant 0 : index
    %c0_15 = arith.constant 0 : index
    %40 = vector.load %arg2[%c0_13, %c0_14, %c0_15] : memref<4x1x8xf32, #tpu.memory_space<vmem>>, vector<4x1x8xf32>
    %cst_16 = arith.constant 1.000000e+00 : f32
    %41 = vector.broadcast %cst_16 : f32 to vector<4x1x8xf32>
    %42 = arith.subf %41, %40 : vector<4x1x8xf32>
    %cst_17 = arith.constant -1.000000e+09 : f32
    %43 = vector.broadcast %cst_17 : f32 to vector<4x1x8xf32>
    %44 = arith.mulf %42, %43 : vector<4x1x8xf32>
    %c0_18 = arith.constant 0 : index
    %c0_19 = arith.constant 0 : index
    %c0_20 = arith.constant 0 : index
    %45 = vector.load %arg6[%c0_18, %c0_19, %c0_20] : memref<2x32x96xf32, #tpu.memory_space<vmem>>, vector<1x32x96xf32>
    %46 = vector.shape_cast %45 : vector<1x32x96xf32> to vector<32x96xf32>
    %c0_21 = arith.constant 0 : index
    %c0_22 = arith.constant 0 : index
    %c0_23 = arith.constant 0 : index
    %47 = vector.load %arg7[%c0_21, %c0_22, %c0_23] : memref<2x32x32xf32, #tpu.memory_space<vmem>>, vector<1x32x32xf32>
    %48 = vector.shape_cast %47 : vector<1x32x32xf32> to vector<32x32xf32>
    %c0_24 = arith.constant 0 : index
    %c0_25 = arith.constant 0 : index
    %c0_26 = arith.constant 0 : index
    %49 = vector.load %arg8[%c0_24, %c0_25, %c0_26] : memref<2x32x64xf32, #tpu.memory_space<vmem>>, vector<1x32x64xf32>
    %50 = vector.shape_cast %49 : vector<1x32x64xf32> to vector<32x64xf32>
    %c0_27 = arith.constant 0 : index
    %c0_28 = arith.constant 0 : index
    %c0_29 = arith.constant 0 : index
    %51 = vector.load %arg9[%c0_27, %c0_28, %c0_29] : memref<2x64x32xf32, #tpu.memory_space<vmem>>, vector<1x64x32xf32>
    %52 = vector.shape_cast %51 : vector<1x64x32xf32> to vector<64x32xf32>
    %cst_30 = arith.constant dense<0.000000e+00> : vector<32x96xf32>
    %53 = tpu.matmul %39, %46, %cst_30 {dimension_numbers = #tpu.dot_dimension_numbers<[1], [0], [0], [1], [0, 0, 1, 1], [], []>} : vector<32x32xf32>, vector<32x96xf32>, vector<32x96xf32> -> vector<32x96xf32>
    %54 = vector.extract_strided_slice %0 {offsets = [2, 0], sizes = [1, 96], strides = [1, 1]} : vector<24x128xf32> to vector<1x96xf32>
    %55 = vector.broadcast %54 : vector<1x96xf32> to vector<32x96xf32>
    %56 = arith.addf %53, %55 : vector<32x96xf32>
    %57 = vector.extract_strided_slice %56 {offsets = [0, 0], sizes = [32, 16], strides = [1, 1]} : vector<32x96xf32> to vector<32x16xf32>
    %58 = vector.shape_cast %57 : vector<32x16xf32> to vector<4x8x16xf32>
    %59 = vector.extract_strided_slice %56 {offsets = [0, 32], sizes = [32, 16], strides = [1, 1]} : vector<32x96xf32> to vector<32x16xf32>
    %60 = vector.shape_cast %59 : vector<32x16xf32> to vector<4x8x16xf32>
    %61 = vector.extract_strided_slice %56 {offsets = [0, 64], sizes = [32, 16], strides = [1, 1]} : vector<32x96xf32> to vector<32x16xf32>
    %62 = vector.shape_cast %61 : vector<32x16xf32> to vector<4x8x16xf32>
    "tpu.trace_start"() <{level = 10 : i32, message = "bqd,bkd->bqk"}> : () -> ()
    %cst_31 = arith.constant dense<0.000000e+00> : vector<4x8x8xf32>
    %63 = tpu.matmul %58, %60, %cst_31 {dimension_numbers = #tpu.dot_dimension_numbers<[2], [2], [1], [1], [0, 0, 0, 1, 1, 1], [0], [0]>} : vector<4x8x16xf32>, vector<4x8x16xf32>, vector<4x8x8xf32> -> vector<4x8x8xf32>
    "tpu.trace_stop"() : () -> ()
    %cst_32 = arith.constant 2.500000e-01 : f32
    %64 = vector.broadcast %cst_32 : f32 to vector<4x8x8xf32>
    %65 = arith.mulf %63, %64 : vector<4x8x8xf32>
    %66 = vector.broadcast %44 : vector<4x1x8xf32> to vector<4x8x8xf32>
    %67 = arith.addf %65, %66 : vector<4x8x8xf32>
    %cst_33 = arith.constant dense<0xFF800000> : vector<4x8xf32>
    %68 = vector.multi_reduction <maximumf>, %67, %cst_33 [2] : vector<4x8x8xf32> to vector<4x8xf32>
    %69 = vector.shape_cast %68 : vector<4x8xf32> to vector<4x8x1xf32>
    %70 = vector.broadcast %69 : vector<4x8x1xf32> to vector<4x8x8xf32>
    %71 = arith.subf %67, %70 : vector<4x8x8xf32>
    %72 = math.exp %71 : vector<4x8x8xf32>
    %cst_34 = arith.constant dense<0.000000e+00> : vector<4x8xf32>
    %73 = vector.multi_reduction <add>, %72, %cst_34 [2] : vector<4x8x8xf32> to vector<4x8xf32>
    %74 = vector.shape_cast %73 : vector<4x8xf32> to vector<4x8x1xf32>
    %75 = tpu.reciprocal %74 {approx = true} : vector<4x8x1xf32> -> vector<4x8x1xf32>
    %76 = vector.broadcast %75 : vector<4x8x1xf32> to vector<4x8x8xf32>
    %77 = arith.mulf %72, %76 : vector<4x8x8xf32>
    "tpu.trace_start"() <{level = 10 : i32, message = "bqk,bkd->bqd"}> : () -> ()
    %cst_35 = arith.constant dense<0.000000e+00> : vector<4x8x16xf32>
    %78 = tpu.matmul %77, %62, %cst_35 {dimension_numbers = #tpu.dot_dimension_numbers<[2], [1], [1], [2], [0, 0, 0, 1, 1, 2], [0], [0]>} : vector<4x8x8xf32>, vector<4x8x16xf32>, vector<4x8x16xf32> -> vector<4x8x16xf32>
    "tpu.trace_stop"() : () -> ()
    %79 = vector.shape_cast %78 : vector<4x8x16xf32> to vector<32x16xf32>
    %80 = vector.extract_strided_slice %56 {offsets = [0, 16], sizes = [32, 16], strides = [1, 1]} : vector<32x96xf32> to vector<32x16xf32>
    %81 = vector.shape_cast %80 : vector<32x16xf32> to vector<4x8x16xf32>
    %82 = vector.extract_strided_slice %56 {offsets = [0, 48], sizes = [32, 16], strides = [1, 1]} : vector<32x96xf32> to vector<32x16xf32>
    %83 = vector.shape_cast %82 : vector<32x16xf32> to vector<4x8x16xf32>
    %84 = vector.extract_strided_slice %56 {offsets = [0, 80], sizes = [32, 16], strides = [1, 1]} : vector<32x96xf32> to vector<32x16xf32>
    %85 = vector.shape_cast %84 : vector<32x16xf32> to vector<4x8x16xf32>
    "tpu.trace_start"() <{level = 10 : i32, message = "bqd,bkd->bqk"}> : () -> ()
    %cst_36 = arith.constant dense<0.000000e+00> : vector<4x8x8xf32>
    %86 = tpu.matmul %81, %83, %cst_36 {dimension_numbers = #tpu.dot_dimension_numbers<[2], [2], [1], [1], [0, 0, 0, 1, 1, 1], [0], [0]>} : vector<4x8x16xf32>, vector<4x8x16xf32>, vector<4x8x8xf32> -> vector<4x8x8xf32>
    "tpu.trace_stop"() : () -> ()
    %cst_37 = arith.constant 2.500000e-01 : f32
    %87 = vector.broadcast %cst_37 : f32 to vector<4x8x8xf32>
    %88 = arith.mulf %86, %87 : vector<4x8x8xf32>
    %89 = vector.broadcast %44 : vector<4x1x8xf32> to vector<4x8x8xf32>
    %90 = arith.addf %88, %89 : vector<4x8x8xf32>
    %cst_38 = arith.constant dense<0xFF800000> : vector<4x8xf32>
    %91 = vector.multi_reduction <maximumf>, %90, %cst_38 [2] : vector<4x8x8xf32> to vector<4x8xf32>
    %92 = vector.shape_cast %91 : vector<4x8xf32> to vector<4x8x1xf32>
    %93 = vector.broadcast %92 : vector<4x8x1xf32> to vector<4x8x8xf32>
    %94 = arith.subf %90, %93 : vector<4x8x8xf32>
    %95 = math.exp %94 : vector<4x8x8xf32>
    %cst_39 = arith.constant dense<0.000000e+00> : vector<4x8xf32>
    %96 = vector.multi_reduction <add>, %95, %cst_39 [2] : vector<4x8x8xf32> to vector<4x8xf32>
    %97 = vector.shape_cast %96 : vector<4x8xf32> to vector<4x8x1xf32>
    %98 = tpu.reciprocal %97 {approx = true} : vector<4x8x1xf32> -> vector<4x8x1xf32>
    %99 = vector.broadcast %98 : vector<4x8x1xf32> to vector<4x8x8xf32>
    %100 = arith.mulf %95, %99 : vector<4x8x8xf32>
    "tpu.trace_start"() <{level = 10 : i32, message = "bqk,bkd->bqd"}> : () -> ()
    %cst_40 = arith.constant dense<0.000000e+00> : vector<4x8x16xf32>
    %101 = tpu.matmul %100, %85, %cst_40 {dimension_numbers = #tpu.dot_dimension_numbers<[2], [1], [1], [2], [0, 0, 0, 1, 1, 2], [0], [0]>} : vector<4x8x8xf32>, vector<4x8x16xf32>, vector<4x8x16xf32> -> vector<4x8x16xf32>
    "tpu.trace_stop"() : () -> ()
    %102 = vector.shape_cast %101 : vector<4x8x16xf32> to vector<32x16xf32>
    %103 = tpu.concatenate %79, %102 in 1 : vector<32x16xf32>, vector<32x16xf32> -> vector<32x32xf32>
    %cst_41 = arith.constant dense<0.000000e+00> : vector<32x32xf32>
    %104 = tpu.matmul %103, %48, %cst_41 {dimension_numbers = #tpu.dot_dimension_numbers<[1], [0], [0], [1], [0, 0, 1, 1], [], []>} : vector<32x32xf32>, vector<32x32xf32>, vector<32x32xf32> -> vector<32x32xf32>
    %105 = vector.extract_strided_slice %0 {offsets = [3, 0], sizes = [1, 32], strides = [1, 1]} : vector<24x128xf32> to vector<1x32xf32>
    %106 = vector.broadcast %105 : vector<1x32xf32> to vector<32x32xf32>
    %107 = arith.addf %104, %106 : vector<32x32xf32>
    %108 = arith.addf %107, %39 : vector<32x32xf32>
    %109 = vector.extract_strided_slice %0 {offsets = [4, 0], sizes = [1, 32], strides = [1, 1]} : vector<24x128xf32> to vector<1x32xf32>
    %110 = vector.extract_strided_slice %0 {offsets = [5, 0], sizes = [1, 32], strides = [1, 1]} : vector<24x128xf32> to vector<1x32xf32>
    %cst_42 = arith.constant dense<0.000000e+00> : vector<32xf32>
    %111 = vector.multi_reduction <add>, %108, %cst_42 [1] : vector<32x32xf32> to vector<32xf32>
    %112 = vector.shape_cast %111 : vector<32xf32> to vector<32x1xf32>
    %cst_43 = arith.constant 3.200000e+01 : f32
    %113 = vector.broadcast %cst_43 : f32 to vector<32x1xf32>
    %114 = arith.divf %112, %113 : vector<32x1xf32>
    %115 = vector.broadcast %114 : vector<32x1xf32> to vector<32x32xf32>
    %116 = arith.subf %108, %115 : vector<32x32xf32>
    %117 = arith.mulf %116, %116 : vector<32x32xf32>
    %cst_44 = arith.constant dense<0.000000e+00> : vector<32xf32>
    %118 = vector.multi_reduction <add>, %117, %cst_44 [1] : vector<32x32xf32> to vector<32xf32>
    %119 = vector.shape_cast %118 : vector<32xf32> to vector<32x1xf32>
    %cst_45 = arith.constant 3.200000e+01 : f32
    %120 = vector.broadcast %cst_45 : f32 to vector<32x1xf32>
    %121 = arith.divf %119, %120 : vector<32x1xf32>
    %122 = vector.broadcast %114 : vector<32x1xf32> to vector<32x32xf32>
    %123 = arith.subf %108, %122 : vector<32x32xf32>
    %cst_46 = arith.constant 9.99999996E-13 : f32
    %124 = vector.broadcast %cst_46 : f32 to vector<32x1xf32>
    %125 = arith.addf %121, %124 : vector<32x1xf32>
    %126 = math.rsqrt %125 : vector<32x1xf32>
    %127 = vector.broadcast %126 : vector<32x1xf32> to vector<32x32xf32>
    %128 = arith.mulf %123, %127 : vector<32x32xf32>
    %129 = vector.broadcast %109 : vector<1x32xf32> to vector<32x32xf32>
    %130 = arith.mulf %128, %129 : vector<32x32xf32>
    %131 = vector.broadcast %110 : vector<1x32xf32> to vector<32x32xf32>
    %132 = arith.addf %130, %131 : vector<32x32xf32>
    %cst_47 = arith.constant dense<0.000000e+00> : vector<32x64xf32>
    %133 = tpu.matmul %132, %50, %cst_47 {dimension_numbers = #tpu.dot_dimension_numbers<[1], [0], [0], [1], [0, 0, 1, 1], [], []>} : vector<32x32xf32>, vector<32x64xf32>, vector<32x64xf32> -> vector<32x64xf32>
    %134 = vector.extract_strided_slice %0 {offsets = [6, 0], sizes = [1, 64], strides = [1, 1]} : vector<24x128xf32> to vector<1x64xf32>
    %135 = vector.broadcast %134 : vector<1x64xf32> to vector<32x64xf32>
    %136 = arith.addf %133, %135 : vector<32x64xf32>
    %137 = arith.mulf %136, %136 : vector<32x64xf32>
    %138 = arith.mulf %136, %137 : vector<32x64xf32>
    %cst_48 = arith.constant 4.471500e-02 : f32
    %139 = vector.broadcast %cst_48 : f32 to vector<32x64xf32>
    %140 = arith.mulf %139, %138 : vector<32x64xf32>
    %141 = arith.addf %136, %140 : vector<32x64xf32>
    %cst_49 = arith.constant 0.797884583 : f32
    %142 = vector.broadcast %cst_49 : f32 to vector<32x64xf32>
    %143 = arith.mulf %142, %141 : vector<32x64xf32>
    %144 = math.tanh %143 : vector<32x64xf32>
    %cst_50 = arith.constant 1.000000e+00 : f32
    %145 = vector.broadcast %cst_50 : f32 to vector<32x64xf32>
    %146 = arith.addf %145, %144 : vector<32x64xf32>
    %cst_51 = arith.constant 5.000000e-01 : f32
    %147 = vector.broadcast %cst_51 : f32 to vector<32x64xf32>
    %148 = arith.mulf %147, %146 : vector<32x64xf32>
    %149 = arith.mulf %136, %148 : vector<32x64xf32>
    %cst_52 = arith.constant dense<0.000000e+00> : vector<32x32xf32>
    %150 = tpu.matmul %149, %52, %cst_52 {dimension_numbers = #tpu.dot_dimension_numbers<[1], [0], [0], [1], [0, 0, 1, 1], [], []>} : vector<32x64xf32>, vector<64x32xf32>, vector<32x32xf32> -> vector<32x32xf32>
    %151 = vector.extract_strided_slice %0 {offsets = [7, 0], sizes = [1, 32], strides = [1, 1]} : vector<24x128xf32> to vector<1x32xf32>
    %152 = vector.broadcast %151 : vector<1x32xf32> to vector<32x32xf32>
    %153 = arith.addf %150, %152 : vector<32x32xf32>
    %154 = arith.addf %153, %132 : vector<32x32xf32>
    %155 = vector.extract_strided_slice %0 {offsets = [8, 0], sizes = [1, 32], strides = [1, 1]} : vector<24x128xf32> to vector<1x32xf32>
    %156 = vector.extract_strided_slice %0 {offsets = [9, 0], sizes = [1, 32], strides = [1, 1]} : vector<24x128xf32> to vector<1x32xf32>
    %cst_53 = arith.constant dense<0.000000e+00> : vector<32xf32>
    %157 = vector.multi_reduction <add>, %154, %cst_53 [1] : vector<32x32xf32> to vector<32xf32>
    %158 = vector.shape_cast %157 : vector<32xf32> to vector<32x1xf32>
    %cst_54 = arith.constant 3.200000e+01 : f32
    %159 = vector.broadcast %cst_54 : f32 to vector<32x1xf32>
    %160 = arith.divf %158, %159 : vector<32x1xf32>
    %161 = vector.broadcast %160 : vector<32x1xf32> to vector<32x32xf32>
    %162 = arith.subf %154, %161 : vector<32x32xf32>
    %163 = arith.mulf %162, %162 : vector<32x32xf32>
    %cst_55 = arith.constant dense<0.000000e+00> : vector<32xf32>
    %164 = vector.multi_reduction <add>, %163, %cst_55 [1] : vector<32x32xf32> to vector<32xf32>
    %165 = vector.shape_cast %164 : vector<32xf32> to vector<32x1xf32>
    %cst_56 = arith.constant 3.200000e+01 : f32
    %166 = vector.broadcast %cst_56 : f32 to vector<32x1xf32>
    %167 = arith.divf %165, %166 : vector<32x1xf32>
    %168 = vector.broadcast %160 : vector<32x1xf32> to vector<32x32xf32>
    %169 = arith.subf %154, %168 : vector<32x32xf32>
    %cst_57 = arith.constant 9.99999996E-13 : f32
    %170 = vector.broadcast %cst_57 : f32 to vector<32x1xf32>
    %171 = arith.addf %167, %170 : vector<32x1xf32>
    %172 = math.rsqrt %171 : vector<32x1xf32>
    %173 = vector.broadcast %172 : vector<32x1xf32> to vector<32x32xf32>
    %174 = arith.mulf %169, %173 : vector<32x32xf32>
    %175 = vector.broadcast %155 : vector<1x32xf32> to vector<32x32xf32>
    %176 = arith.mulf %174, %175 : vector<32x32xf32>
    %177 = vector.broadcast %156 : vector<1x32xf32> to vector<32x32xf32>
    %178 = arith.addf %176, %177 : vector<32x32xf32>
    %c1 = arith.constant 1 : index
    %c0_58 = arith.constant 0 : index
    %c0_59 = arith.constant 0 : index
    %179 = vector.load %arg6[%c1, %c0_58, %c0_59] : memref<2x32x96xf32, #tpu.memory_space<vmem>>, vector<1x32x96xf32>
    %180 = vector.shape_cast %179 : vector<1x32x96xf32> to vector<32x96xf32>
    %c1_60 = arith.constant 1 : index
    %c0_61 = arith.constant 0 : index
    %c0_62 = arith.constant 0 : index
    %181 = vector.load %arg7[%c1_60, %c0_61, %c0_62] : memref<2x32x32xf32, #tpu.memory_space<vmem>>, vector<1x32x32xf32>
    %182 = vector.shape_cast %181 : vector<1x32x32xf32> to vector<32x32xf32>
    %c1_63 = arith.constant 1 : index
    %c0_64 = arith.constant 0 : index
    %c0_65 = arith.constant 0 : index
    %183 = vector.load %arg8[%c1_63, %c0_64, %c0_65] : memref<2x32x64xf32, #tpu.memory_space<vmem>>, vector<1x32x64xf32>
    %184 = vector.shape_cast %183 : vector<1x32x64xf32> to vector<32x64xf32>
    %c1_66 = arith.constant 1 : index
    %c0_67 = arith.constant 0 : index
    %c0_68 = arith.constant 0 : index
    %185 = vector.load %arg9[%c1_66, %c0_67, %c0_68] : memref<2x64x32xf32, #tpu.memory_space<vmem>>, vector<1x64x32xf32>
    %186 = vector.shape_cast %185 : vector<1x64x32xf32> to vector<64x32xf32>
    %cst_69 = arith.constant dense<0.000000e+00> : vector<32x96xf32>
    %187 = tpu.matmul %178, %180, %cst_69 {dimension_numbers = #tpu.dot_dimension_numbers<[1], [0], [0], [1], [0, 0, 1, 1], [], []>} : vector<32x32xf32>, vector<32x96xf32>, vector<32x96xf32> -> vector<32x96xf32>
    %188 = vector.extract_strided_slice %0 {offsets = [10, 0], sizes = [1, 96], strides = [1, 1]} : vector<24x128xf32> to vector<1x96xf32>
    %189 = vector.broadcast %188 : vector<1x96xf32> to vector<32x96xf32>
    %190 = arith.addf %187, %189 : vector<32x96xf32>
    %191 = vector.extract_strided_slice %190 {offsets = [0, 0], sizes = [32, 16], strides = [1, 1]} : vector<32x96xf32> to vector<32x16xf32>
    %192 = vector.shape_cast %191 : vector<32x16xf32> to vector<4x8x16xf32>
    %193 = vector.extract_strided_slice %190 {offsets = [0, 32], sizes = [32, 16], strides = [1, 1]} : vector<32x96xf32> to vector<32x16xf32>
    %194 = vector.shape_cast %193 : vector<32x16xf32> to vector<4x8x16xf32>
    %195 = vector.extract_strided_slice %190 {offsets = [0, 64], sizes = [32, 16], strides = [1, 1]} : vector<32x96xf32> to vector<32x16xf32>
    %196 = vector.shape_cast %195 : vector<32x16xf32> to vector<4x8x16xf32>
    "tpu.trace_start"() <{level = 10 : i32, message = "bqd,bkd->bqk"}> : () -> ()
    %cst_70 = arith.constant dense<0.000000e+00> : vector<4x8x8xf32>
    %197 = tpu.matmul %192, %194, %cst_70 {dimension_numbers = #tpu.dot_dimension_numbers<[2], [2], [1], [1], [0, 0, 0, 1, 1, 1], [0], [0]>} : vector<4x8x16xf32>, vector<4x8x16xf32>, vector<4x8x8xf32> -> vector<4x8x8xf32>
    "tpu.trace_stop"() : () -> ()
    %cst_71 = arith.constant 2.500000e-01 : f32
    %198 = vector.broadcast %cst_71 : f32 to vector<4x8x8xf32>
    %199 = arith.mulf %197, %198 : vector<4x8x8xf32>
    %200 = vector.broadcast %44 : vector<4x1x8xf32> to vector<4x8x8xf32>
    %201 = arith.addf %199, %200 : vector<4x8x8xf32>
    %cst_72 = arith.constant dense<0xFF800000> : vector<4x8xf32>
    %202 = vector.multi_reduction <maximumf>, %201, %cst_72 [2] : vector<4x8x8xf32> to vector<4x8xf32>
    %203 = vector.shape_cast %202 : vector<4x8xf32> to vector<4x8x1xf32>
    %204 = vector.broadcast %203 : vector<4x8x1xf32> to vector<4x8x8xf32>
    %205 = arith.subf %201, %204 : vector<4x8x8xf32>
    %206 = math.exp %205 : vector<4x8x8xf32>
    %cst_73 = arith.constant dense<0.000000e+00> : vector<4x8xf32>
    %207 = vector.multi_reduction <add>, %206, %cst_73 [2] : vector<4x8x8xf32> to vector<4x8xf32>
    %208 = vector.shape_cast %207 : vector<4x8xf32> to vector<4x8x1xf32>
    %209 = tpu.reciprocal %208 {approx = true} : vector<4x8x1xf32> -> vector<4x8x1xf32>
    %210 = vector.broadcast %209 : vector<4x8x1xf32> to vector<4x8x8xf32>
    %211 = arith.mulf %206, %210 : vector<4x8x8xf32>
    "tpu.trace_start"() <{level = 10 : i32, message = "bqk,bkd->bqd"}> : () -> ()
    %cst_74 = arith.constant dense<0.000000e+00> : vector<4x8x16xf32>
    %212 = tpu.matmul %211, %196, %cst_74 {dimension_numbers = #tpu.dot_dimension_numbers<[2], [1], [1], [2], [0, 0, 0, 1, 1, 2], [0], [0]>} : vector<4x8x8xf32>, vector<4x8x16xf32>, vector<4x8x16xf32> -> vector<4x8x16xf32>
    "tpu.trace_stop"() : () -> ()
    %213 = vector.shape_cast %212 : vector<4x8x16xf32> to vector<32x16xf32>
    %214 = vector.extract_strided_slice %190 {offsets = [0, 16], sizes = [32, 16], strides = [1, 1]} : vector<32x96xf32> to vector<32x16xf32>
    %215 = vector.shape_cast %214 : vector<32x16xf32> to vector<4x8x16xf32>
    %216 = vector.extract_strided_slice %190 {offsets = [0, 48], sizes = [32, 16], strides = [1, 1]} : vector<32x96xf32> to vector<32x16xf32>
    %217 = vector.shape_cast %216 : vector<32x16xf32> to vector<4x8x16xf32>
    %218 = vector.extract_strided_slice %190 {offsets = [0, 80], sizes = [32, 16], strides = [1, 1]} : vector<32x96xf32> to vector<32x16xf32>
    %219 = vector.shape_cast %218 : vector<32x16xf32> to vector<4x8x16xf32>
    "tpu.trace_start"() <{level = 10 : i32, message = "bqd,bkd->bqk"}> : () -> ()
    %cst_75 = arith.constant dense<0.000000e+00> : vector<4x8x8xf32>
    %220 = tpu.matmul %215, %217, %cst_75 {dimension_numbers = #tpu.dot_dimension_numbers<[2], [2], [1], [1], [0, 0, 0, 1, 1, 1], [0], [0]>} : vector<4x8x16xf32>, vector<4x8x16xf32>, vector<4x8x8xf32> -> vector<4x8x8xf32>
    "tpu.trace_stop"() : () -> ()
    %cst_76 = arith.constant 2.500000e-01 : f32
    %221 = vector.broadcast %cst_76 : f32 to vector<4x8x8xf32>
    %222 = arith.mulf %220, %221 : vector<4x8x8xf32>
    %223 = vector.broadcast %44 : vector<4x1x8xf32> to vector<4x8x8xf32>
    %224 = arith.addf %222, %223 : vector<4x8x8xf32>
    %cst_77 = arith.constant dense<0xFF800000> : vector<4x8xf32>
    %225 = vector.multi_reduction <maximumf>, %224, %cst_77 [2] : vector<4x8x8xf32> to vector<4x8xf32>
    %226 = vector.shape_cast %225 : vector<4x8xf32> to vector<4x8x1xf32>
    %227 = vector.broadcast %226 : vector<4x8x1xf32> to vector<4x8x8xf32>
    %228 = arith.subf %224, %227 : vector<4x8x8xf32>
    %229 = math.exp %228 : vector<4x8x8xf32>
    %cst_78 = arith.constant dense<0.000000e+00> : vector<4x8xf32>
    %230 = vector.multi_reduction <add>, %229, %cst_78 [2] : vector<4x8x8xf32> to vector<4x8xf32>
    %231 = vector.shape_cast %230 : vector<4x8xf32> to vector<4x8x1xf32>
    %232 = tpu.reciprocal %231 {approx = true} : vector<4x8x1xf32> -> vector<4x8x1xf32>
    %233 = vector.broadcast %232 : vector<4x8x1xf32> to vector<4x8x8xf32>
    %234 = arith.mulf %229, %233 : vector<4x8x8xf32>
    "tpu.trace_start"() <{level = 10 : i32, message = "bqk,bkd->bqd"}> : () -> ()
    %cst_79 = arith.constant dense<0.000000e+00> : vector<4x8x16xf32>
    %235 = tpu.matmul %234, %219, %cst_79 {dimension_numbers = #tpu.dot_dimension_numbers<[2], [1], [1], [2], [0, 0, 0, 1, 1, 2], [0], [0]>} : vector<4x8x8xf32>, vector<4x8x16xf32>, vector<4x8x16xf32> -> vector<4x8x16xf32>
    "tpu.trace_stop"() : () -> ()
    %236 = vector.shape_cast %235 : vector<4x8x16xf32> to vector<32x16xf32>
    %237 = tpu.concatenate %213, %236 in 1 : vector<32x16xf32>, vector<32x16xf32> -> vector<32x32xf32>
    %cst_80 = arith.constant dense<0.000000e+00> : vector<32x32xf32>
    %238 = tpu.matmul %237, %182, %cst_80 {dimension_numbers = #tpu.dot_dimension_numbers<[1], [0], [0], [1], [0, 0, 1, 1], [], []>} : vector<32x32xf32>, vector<32x32xf32>, vector<32x32xf32> -> vector<32x32xf32>
    %239 = vector.extract_strided_slice %0 {offsets = [11, 0], sizes = [1, 32], strides = [1, 1]} : vector<24x128xf32> to vector<1x32xf32>
    %240 = vector.broadcast %239 : vector<1x32xf32> to vector<32x32xf32>
    %241 = arith.addf %238, %240 : vector<32x32xf32>
    %242 = arith.addf %241, %178 : vector<32x32xf32>
    %243 = vector.extract_strided_slice %0 {offsets = [12, 0], sizes = [1, 32], strides = [1, 1]} : vector<24x128xf32> to vector<1x32xf32>
    %244 = vector.extract_strided_slice %0 {offsets = [13, 0], sizes = [1, 32], strides = [1, 1]} : vector<24x128xf32> to vector<1x32xf32>
    %cst_81 = arith.constant dense<0.000000e+00> : vector<32xf32>
    %245 = vector.multi_reduction <add>, %242, %cst_81 [1] : vector<32x32xf32> to vector<32xf32>
    %246 = vector.shape_cast %245 : vector<32xf32> to vector<32x1xf32>
    %cst_82 = arith.constant 3.200000e+01 : f32
    %247 = vector.broadcast %cst_82 : f32 to vector<32x1xf32>
    %248 = arith.divf %246, %247 : vector<32x1xf32>
    %249 = vector.broadcast %248 : vector<32x1xf32> to vector<32x32xf32>
    %250 = arith.subf %242, %249 : vector<32x32xf32>
    %251 = arith.mulf %250, %250 : vector<32x32xf32>
    %cst_83 = arith.constant dense<0.000000e+00> : vector<32xf32>
    %252 = vector.multi_reduction <add>, %251, %cst_83 [1] : vector<32x32xf32> to vector<32xf32>
    %253 = vector.shape_cast %252 : vector<32xf32> to vector<32x1xf32>
    %cst_84 = arith.constant 3.200000e+01 : f32
    %254 = vector.broadcast %cst_84 : f32 to vector<32x1xf32>
    %255 = arith.divf %253, %254 : vector<32x1xf32>
    %256 = vector.broadcast %248 : vector<32x1xf32> to vector<32x32xf32>
    %257 = arith.subf %242, %256 : vector<32x32xf32>
    %cst_85 = arith.constant 9.99999996E-13 : f32
    %258 = vector.broadcast %cst_85 : f32 to vector<32x1xf32>
    %259 = arith.addf %255, %258 : vector<32x1xf32>
    %260 = math.rsqrt %259 : vector<32x1xf32>
    %261 = vector.broadcast %260 : vector<32x1xf32> to vector<32x32xf32>
    %262 = arith.mulf %257, %261 : vector<32x32xf32>
    %263 = vector.broadcast %243 : vector<1x32xf32> to vector<32x32xf32>
    %264 = arith.mulf %262, %263 : vector<32x32xf32>
    %265 = vector.broadcast %244 : vector<1x32xf32> to vector<32x32xf32>
    %266 = arith.addf %264, %265 : vector<32x32xf32>
    %cst_86 = arith.constant dense<0.000000e+00> : vector<32x64xf32>
    %267 = tpu.matmul %266, %184, %cst_86 {dimension_numbers = #tpu.dot_dimension_numbers<[1], [0], [0], [1], [0, 0, 1, 1], [], []>} : vector<32x32xf32>, vector<32x64xf32>, vector<32x64xf32> -> vector<32x64xf32>
    %268 = vector.extract_strided_slice %0 {offsets = [14, 0], sizes = [1, 64], strides = [1, 1]} : vector<24x128xf32> to vector<1x64xf32>
    %269 = vector.broadcast %268 : vector<1x64xf32> to vector<32x64xf32>
    %270 = arith.addf %267, %269 : vector<32x64xf32>
    %271 = arith.mulf %270, %270 : vector<32x64xf32>
    %272 = arith.mulf %270, %271 : vector<32x64xf32>
    %cst_87 = arith.constant 4.471500e-02 : f32
    %273 = vector.broadcast %cst_87 : f32 to vector<32x64xf32>
    %274 = arith.mulf %273, %272 : vector<32x64xf32>
    %275 = arith.addf %270, %274 : vector<32x64xf32>
    %cst_88 = arith.constant 0.797884583 : f32
    %276 = vector.broadcast %cst_88 : f32 to vector<32x64xf32>
    %277 = arith.mulf %276, %275 : vector<32x64xf32>
    %278 = math.tanh %277 : vector<32x64xf32>
    %cst_89 = arith.constant 1.000000e+00 : f32
    %279 = vector.broadcast %cst_89 : f32 to vector<32x64xf32>
    %280 = arith.addf %279, %278 : vector<32x64xf32>
    %cst_90 = arith.constant 5.000000e-01 : f32
    %281 = vector.broadcast %cst_90 : f32 to vector<32x64xf32>
    %282 = arith.mulf %281, %280 : vector<32x64xf32>
    %283 = arith.mulf %270, %282 : vector<32x64xf32>
    %cst_91 = arith.constant dense<0.000000e+00> : vector<32x32xf32>
    %284 = tpu.matmul %283, %186, %cst_91 {dimension_numbers = #tpu.dot_dimension_numbers<[1], [0], [0], [1], [0, 0, 1, 1], [], []>} : vector<32x64xf32>, vector<64x32xf32>, vector<32x32xf32> -> vector<32x32xf32>
    %285 = vector.extract_strided_slice %0 {offsets = [15, 0], sizes = [1, 32], strides = [1, 1]} : vector<24x128xf32> to vector<1x32xf32>
    %286 = vector.broadcast %285 : vector<1x32xf32> to vector<32x32xf32>
    %287 = arith.addf %284, %286 : vector<32x32xf32>
    %288 = arith.addf %287, %266 : vector<32x32xf32>
    %289 = vector.extract_strided_slice %0 {offsets = [16, 0], sizes = [1, 32], strides = [1, 1]} : vector<24x128xf32> to vector<1x32xf32>
    %290 = vector.extract_strided_slice %0 {offsets = [17, 0], sizes = [1, 32], strides = [1, 1]} : vector<24x128xf32> to vector<1x32xf32>
    %cst_92 = arith.constant dense<0.000000e+00> : vector<32xf32>
    %291 = vector.multi_reduction <add>, %288, %cst_92 [1] : vector<32x32xf32> to vector<32xf32>
    %292 = vector.shape_cast %291 : vector<32xf32> to vector<32x1xf32>
    %cst_93 = arith.constant 3.200000e+01 : f32
    %293 = vector.broadcast %cst_93 : f32 to vector<32x1xf32>
    %294 = arith.divf %292, %293 : vector<32x1xf32>
    %295 = vector.broadcast %294 : vector<32x1xf32> to vector<32x32xf32>
    %296 = arith.subf %288, %295 : vector<32x32xf32>
    %297 = arith.mulf %296, %296 : vector<32x32xf32>
    %cst_94 = arith.constant dense<0.000000e+00> : vector<32xf32>
    %298 = vector.multi_reduction <add>, %297, %cst_94 [1] : vector<32x32xf32> to vector<32xf32>
    %299 = vector.shape_cast %298 : vector<32xf32> to vector<32x1xf32>
    %cst_95 = arith.constant 3.200000e+01 : f32
    %300 = vector.broadcast %cst_95 : f32 to vector<32x1xf32>
    %301 = arith.divf %299, %300 : vector<32x1xf32>
    %302 = vector.broadcast %294 : vector<32x1xf32> to vector<32x32xf32>
    %303 = arith.subf %288, %302 : vector<32x32xf32>
    %cst_96 = arith.constant 9.99999996E-13 : f32
    %304 = vector.broadcast %cst_96 : f32 to vector<32x1xf32>
    %305 = arith.addf %301, %304 : vector<32x1xf32>
    %306 = math.rsqrt %305 : vector<32x1xf32>
    %307 = vector.broadcast %306 : vector<32x1xf32> to vector<32x32xf32>
    %308 = arith.mulf %303, %307 : vector<32x32xf32>
    %309 = vector.broadcast %289 : vector<1x32xf32> to vector<32x32xf32>
    %310 = arith.mulf %308, %309 : vector<32x32xf32>
    %311 = vector.broadcast %290 : vector<1x32xf32> to vector<32x32xf32>
    %312 = arith.addf %310, %311 : vector<32x32xf32>
    %313 = vector.shape_cast %312 : vector<32x32xf32> to vector<4x8x32xf32>
    %314 = vector.extract_strided_slice %313 {offsets = [0, 0, 0], sizes = [4, 1, 32], strides = [1, 1, 1]} : vector<4x8x32xf32> to vector<4x1x32xf32>
    %315 = vector.shape_cast %314 : vector<4x1x32xf32> to vector<4x32xf32>
    %c0_97 = arith.constant 0 : index
    %c0_98 = arith.constant 0 : index
    %316 = vector.load %arg10[%c0_97, %c0_98] : memref<32x32xf32, #tpu.memory_space<vmem>>, vector<32x32xf32>
    %cst_99 = arith.constant dense<0.000000e+00> : vector<4x32xf32>
    %317 = tpu.matmul %315, %316, %cst_99 {dimension_numbers = #tpu.dot_dimension_numbers<[1], [0], [0], [1], [0, 0, 1, 1], [], []>} : vector<4x32xf32>, vector<32x32xf32>, vector<4x32xf32> -> vector<4x32xf32>
    %318 = vector.extract_strided_slice %0 {offsets = [18, 0], sizes = [1, 32], strides = [1, 1]} : vector<24x128xf32> to vector<1x32xf32>
    %319 = vector.broadcast %318 : vector<1x32xf32> to vector<4x32xf32>
    %320 = arith.addf %317, %319 : vector<4x32xf32>
    %321 = math.tanh %320 : vector<4x32xf32>
    %c0_100 = arith.constant 0 : index
    %c0_101 = arith.constant 0 : index
    %322 = vector.load %arg11[%c0_100, %c0_101] : memref<32x128xf32, #tpu.memory_space<vmem>>, vector<32x128xf32>
    %cst_102 = arith.constant dense<0.000000e+00> : vector<4x128xf32>
    %323 = tpu.matmul %321, %322, %cst_102 {dimension_numbers = #tpu.dot_dimension_numbers<[1], [0], [0], [1], [0, 0, 1, 1], [], []>} : vector<4x32xf32>, vector<32x128xf32>, vector<4x128xf32> -> vector<4x128xf32>
    %324 = vector.extract_strided_slice %0 {offsets = [19, 0], sizes = [1, 128], strides = [1, 1]} : vector<24x128xf32> to vector<1x128xf32>
    %325 = vector.broadcast %324 : vector<1x128xf32> to vector<4x128xf32>
    %326 = arith.addf %323, %325 : vector<4x128xf32>
    %327 = vector.shape_cast %326 : vector<4x128xf32> to vector<4x1x128xf32>
    %c0_103 = arith.constant 0 : index
    %c0_104 = arith.constant 0 : index
    %c0_105 = arith.constant 0 : index
    %328 = vector.load %arg12[%c0_103, %c0_104, %c0_105] : memref<4x1x128xf32, #tpu.memory_space<vmem>>, vector<4x1x128xf32>
    tpu.vector_store %arg12[%c0_103, %c0_104, %c0_105], %327 {strides = array<i32>} : memref<4x1x128xf32, #tpu.memory_space<vmem>>, vector<4x1x128xf32>,
    return
  }
  func.func @transform_0(%arg0: i32) -> (i32, i32, i32) {
    %c0_i32 = arith.constant 0 : i32
    %c0_i32_0 = arith.constant 0 : i32
    %c0_i32_1 = arith.constant 0 : i32
    return %arg0, %c0_i32, %c0_i32_0 : i32, i32, i32
  }
  func.func @transform_1(%arg0: i32) -> (i32, i32, i32) {
    %c0_i32 = arith.constant 0 : i32
    %c0_i32_0 = arith.constant 0 : i32
    %c0_i32_1 = arith.constant 0 : i32
    return %arg0, %c0_i32, %c0_i32_0 : i32, i32, i32
  }
  func.func @transform_2(%arg0: i32) -> (i32, i32) {
    %c0_i32 = arith.constant 0 : i32
    %c0_i32_0 = arith.constant 0 : i32
    %c0_i32_1 = arith.constant 0 : i32
    return %c0_i32, %c0_i32_0 : i32, i32
  }
  func.func @transform_3(%arg0: i32) -> (i32, i32) {
    %c0_i32 = arith.constant 0 : i32
    %c0_i32_0 = arith.constant 0 : i32
    %c0_i32_1 = arith.constant 0 : i32
    return %c0_i32, %c0_i32_0 : i32, i32
  }
  func.func @transform_4(%arg0: i32) -> (i32, i32) {
    %c0_i32 = arith.constant 0 : i32
    %c0_i32_0 = arith.constant 0 : i32
    %c0_i32_1 = arith.constant 0 : i32
    return %c0_i32, %c0_i32_0 : i32, i32
  }
  func.func @transform_5(%arg0: i32) -> (i32, i32, i32) {
    %c0_i32 = arith.constant 0 : i32
    %c0_i32_0 = arith.constant 0 : i32
    %c0_i32_1 = arith.constant 0 : i32
    %c0_i32_2 = arith.constant 0 : i32
    return %c0_i32, %c0_i32_0, %c0_i32_1 : i32, i32, i32
  }
  func.func @transform_6(%arg0: i32) -> (i32, i32, i32) {
    %c0_i32 = arith.constant 0 : i32
    %c0_i32_0 = arith.constant 0 : i32
    %c0_i32_1 = arith.constant 0 : i32
    %c0_i32_2 = arith.constant 0 : i32
    return %c0_i32, %c0_i32_0, %c0_i32_1 : i32, i32, i32
  }
  func.func @transform_7(%arg0: i32) -> (i32, i32, i32) {
    %c0_i32 = arith.constant 0 : i32
    %c0_i32_0 = arith.constant 0 : i32
    %c0_i32_1 = arith.constant 0 : i32
    %c0_i32_2 = arith.constant 0 : i32
    return %c0_i32, %c0_i32_0, %c0_i32_1 : i32, i32, i32
  }
  func.func @transform_8(%arg0: i32) -> (i32, i32, i32) {
    %c0_i32 = arith.constant 0 : i32
    %c0_i32_0 = arith.constant 0 : i32
    %c0_i32_1 = arith.constant 0 : i32
    %c0_i32_2 = arith.constant 0 : i32
    return %c0_i32, %c0_i32_0, %c0_i32_1 : i32, i32, i32
  }
  func.func @transform_9(%arg0: i32) -> (i32, i32) {
    %c0_i32 = arith.constant 0 : i32
    %c0_i32_0 = arith.constant 0 : i32
    %c0_i32_1 = arith.constant 0 : i32
    return %c0_i32, %c0_i32_0 : i32, i32
  }
  func.func @transform_10(%arg0: i32) -> (i32, i32) {
    %c0_i32 = arith.constant 0 : i32
    %c0_i32_0 = arith.constant 0 : i32
    %c0_i32_1 = arith.constant 0 : i32
    return %c0_i32, %c0_i32_0 : i32, i32
  }
  func.func @transform_11(%arg0: i32) -> (i32, i32, i32) {
    %c0_i32 = arith.constant 0 : i32
    %c0_i32_0 = arith.constant 0 : i32
    %c0_i32_1 = arith.constant 0 : i32
    return %arg0, %c0_i32, %c0_i32_0 : i32, i32, i32
  }
}

</mosaic_0001>

<bundles_post_ra>
// kernel: news_classifier_forward.1
= control target key start
LH: loop header
LB: loop body
LE: loop exit
PB: predicated region body
PF: predicated region fallthrough
CT: control target
= control target key end

     0   :  { %s5824_s17 = smov 0   ;;  %s6614_s0 = inlined_call_operand.vmem [shape: s32[8,8,1], index: 0, kind: input, shape index: {}]   ;;  %s6615_s1 = inlined_call_operand.vmem [shape: f32[8,1,8], index: 1, kind: input, shape index: {}]   ;;  %s6616_s2 = inlined_call_operand.vmem [shape: f32[128,32], index: 2, kind: input, shape index: {}]   ;;  %s6617_s3 = inlined_call_operand.vmem [shape: f32[8,32], index: 3, kind: input, shape index: {}]   ;;  %s6618_s4 = inlined_call_operand.vmem [shape: f32[24,128], index: 4, kind: input, shape index: {}]   ;;  %s6619_s5 = inlined_call_operand.vmem [shape: f32[2,32,96], index: 5, kind: input, shape index: {}]   ;;  %s6620_s6 = inlined_call_operand.vmem [shape: f32[2,32,32], index: 6, kind: input, shape index: {}]   ;;  %s6621_s7 = inlined_call_operand.vmem [shape: f32[2,32,64], index: 7, kind: input, shape index: {}]   ;;  %s6622_s8 = inlined_call_operand.vmem [shape: f32[2,64,32], index: 8, kind: input, shape index: {}]   ;;  %s6623_s9 = inlined_call_operand.vmem [shape: f32[32,32], index: 9, kind: input, shape index: {}]   ;;  %s6624_s10 = inlined_call_operand.vmem [shape: f32[32,128], index: 10, kind: input, shape index: {}]   ;;  %s6625_s11 = inlined_call_operand.vmem [shape: f32[8,1,128], index: 11, kind: output, shape index: {}]  }
   0x1 LB: > { %s4838_s18 = sadd.s32 4294967295, %s5750_s17   ;;  %p4842_p0 = scmp.ge.s32.totalorder %s5750_s17, 1  ;;  %s5750_s17 = sphi %s5824_s17, %s21_s17  }
   0x2   : > { %p348_p1 = scmp.lt.s32.totalorder %s5750_s17, 3 }
   0x4   : > { %p349_p2 = pnand %p4842_p0, %p348_p1 }
   0x5   : > { %s4843_s19 = sshll.u32 (!%p349_p2), %s4838_s18, 2  ;;  %v440_v0 = vld [vmem:[%s6616_s2] sm:$0xff] (!%p349_p2)  ;;  %v441_v1 = vld [vmem:[%s6616_s2 + $0x8] sm:$0xff] (!%p349_p2)  ;;  %v442_v2 = vld [vmem:[%s6616_s2 + $0x10] sm:$0xff] (!%p349_p2)  ;;  %v5752_v3 = vmov (!%p349_p2), 0   ;;  %v414_v29 = vlaneseq (!%p349_p2)  ;;  %v5753_v33 = vmov (!%p349_p2), 1.0  }
   0x6   : > { %352 = sbr.rel (%p349_p2) target bundleno = 7314 (0x1c92), region = 64  ;;  %5619 = vset.pattern.permute.xlu0 (!%p349_p2), %v5752_v3  ;;  %p392_p3 = scmp.lt.s32.totalorder (!%p349_p2), %s4843_s19, 7  ;;  %5620 = vset.pattern.permute.xlu1 (!%p349_p2), %v5752_v3  ;;  %v5475_v4 = vpack.c.bf16 (!%p349_p2), %v441_v1, %v440_v0  ;;  %v443_v5 = vld [vmem:[%s6616_s2 + $0x18] sm:$0xff] (!%p349_p2)  ;;  %v444_v7 = vld [vmem:[%s6616_s2 + $0x20] sm:$0xff] (!%p349_p2)  ;;  %v445_v8 = vld [vmem:[%s6616_s2 + $0x28] sm:$0xff] (!%p349_p2)  ;;  %vm546_vm4 = vcmask (!%p349_p2), 261120  }
   0x7   : > { %v5479_v6 = vpack.c.bf16 (!%p349_p2), %v443_v5, %v442_v2  ;;  %v5483_v9 = vpack.c.bf16 (!%p349_p2), %v445_v8, %v444_v7  ;;  %v446_v10 = vld [vmem:[%s6616_s2 + $0x30] sm:$0xff] (!%p349_p2)  ;;  %v447_v13 = vld [vmem:[%s6616_s2 + $0x38] sm:$0xff] (!%p349_p2)  ;;  %v448_v17 = vld [vmem:[%s6616_s2 + $0x40] sm:$0xff] (!%p349_p2)  ;;  %v415_v30 = vand.u32 (!%p349_p2), 127, %v414_v29  ;;  %vm5755_vm5 = vmmov (!%p349_p2), 0   ;;  %s5756_s15 = smov (!%p349_p2), 96  }
   0x8   : > { %5476 = vmatprep.subr.bf16.mxu0 (!%p349_p2), %v5475_v4  ;;  %v5487_v16 = vpack.c.bf16 (!%p349_p2), %v447_v13, %v446_v10  ;;  %v449_v18 = vld [vmem:[%s6616_s2 + $0x48] sm:$0xff] (!%p349_p2)  ;;  %v450_v20 = vld [vmem:[%s6616_s2 + $0x50] sm:$0xff] (!%p349_p2)  ;;  %v451_v21 = vld [vmem:[%s6616_s2 + $0x58] sm:$0xff] (!%p349_p2)  ;;  %vm752_vm6 = vcmask (!%p349_p2), 130048   ;;  %vm1090_vm7 = vcmask (!%p349_p2), 64512   ;;  %s5758_s22 = smov (!%p349_p2), 80  }
   0x9   : > { %5478 = vmatpush3.bf16.msra.mxu0 (!%p349_p2), %v5475_v4  ;;  %v5491_v19 = vpack.c.bf16 (!%p349_p2), %v449_v18, %v448_v17  ;;  %v5495_v22 = vpack.c.bf16 (!%p349_p2), %v451_v21, %v450_v20  ;;  %v452_v23 = vld [vmem:[%s6616_s2 + $0x60] sm:$0xff] (!%p349_p2)  ;;  %v453_v24 = vld [vmem:[%s6616_s2 + $0x68] sm:$0xff] (!%p349_p2)  ;;  %v454_v26 = vld [vmem:[%s6616_s2 + $0x70] sm:$0xff] (!%p349_p2)  ;;  %v5911_v18 = vshrl.u32 (!%p349_p2), %v414_v29, 7  ;;  %s5759_s23 = smov (!%p349_p2), 112   ;;  %s5760_s24 = smov (!%p349_p2), 48  }
   0xa   : > { %5480 = vmatprep.subr.bf16.mxu0 (!%p349_p2), %v5479_v6  ;;  %v5499_v25 = vpack.c.bf16 (!%p349_p2), %v453_v24, %v452_v23  ;;  %v455_v27 = vld [vmem:[%s6616_s2 + $0x78] sm:$0xff] (!%p349_p2)  ;;  %v541_v36 = vld [vmem:[%s6617_s3] sm:$0xff] (!%p349_p2)  ;;  %v630_v8 = vld [vmem:[%s6619_s5 + $0x10] sm:$0xff] (!%p349_p2)  ;;  %s5761_s14 = smov (!%p349_p2), 16   ;;  %vm2441_vm8 = vcmask (!%p349_p2), 523264   ;;  %vm4584_vm9 = vcmask (!%p349_p2), 1041409  }
   0xb   : > { %v5503_v28 = vpack.c.bf16 (!%p349_p2), %v455_v27, %v454_v26  ;;  %v628_v5 = vld [vmem:[%s6619_s5] sm:$0xff] (!%p349_p2)  ;;  %v5914_v23 = vsub.s32 (!%p349_p2), 0, %v5911_v18  ;;  %v5922_v26 = vsub.s32 (!%p349_p2), 1, %v5911_v18  ;;  %vm4587_vm10 = vcmask (!%p349_p2), 1042434  }
   0xc   : > { %v5919_v24 = vld [vmem:[%s6618_s4] sm:$0xff] (!%p349_p2)  ;;  %vm4590_vm11 = vcmask (!%p349_p2), 1043459  }
   0xd   : > { %s6627_s19 = smov (!%p392_p3, %s4843_s19), 7  ;;  %5482 = vmatpush3.bf16.msra.mxu0 %v5479_v6  ;;  %v629_v6 = vld [vmem:[%s6619_s5 + $0x8] sm:$0xff]  ;;  %v603_v27 = vrot.slane %v5919_v24, %v5914_v23 }
   0xe   : > { %s4844_s13 = sshll.u32 %s6627_s19, 3  ;;  %5484 = vmatprep.subr.bf16.mxu0 %v5483_v9  ;;  %v5507_v7 = vpack.c.bf16 %v629_v6, %v628_v5  ;;  %s400_s21 = scalar_lea.vmem %s6615_s1, %s6627_s19 }
   0xf   : > { %s395_s16 = scalar_lea.vmem %s6614_s0, %s4844_s13 }
  0x10   : > { %v410_v11 = vld [vmem:[%s395_s16] sm:$0xff]  ;;  %v412_v12 = vld [vmem:[%s395_s16 + $0x10] sm:$0xff]  ;;  %v411_v14 = vld [vmem:[%s395_s16 + $0x8] sm:$0xff]  ;;  %5508 = vmatprep.subr.bf16.mxu1 %v5507_v7 }
  0x11   : > { %417 = vperm.xlu0 %5619, %v410_v11   ;;  %423 = vperm.xlu1 %5620, %v412_v12   ;;  %v413_v15 = vld [vmem:[%s395_s16 + $0x18] sm:$0xff]  ;;  %s5757_s16 = smov 64  }
  0x12   : > { %5486 = vmatpush3.bf16.msra.mxu0 %v5483_v9  ;;  %v631_v9 = vld [vmem:[%s6619_s5 + $0x18] sm:$0xff]  ;;  %5510 = vmatpush3.bf16.msra.mxu1 %v5507_v7  ;;  %v619_v7 = vld [vmem:[%s400_s21 + $0x3] sm:$0x1] }
  0x13   : > { %5488 = vmatprep.subr.bf16.mxu0 %v5487_v16  ;;  %v5511_v10 = vpack.c.bf16 %v631_v9, %v630_v8 }
  0x15   : > { %420 = vperm.xlu0 %5619, %v411_v14   ;;  %426 = vperm.xlu1 %5620, %v413_v15  }
  0x16   : > { %5490 = vmatpush3.bf16.msra.mxu0 %v5487_v16  ;;  %5512 = vmatprep.subr.bf16.mxu1 %v5511_v10 }
  0x17   : > { %5492 = vmatprep.subr.bf16.mxu0 %v5491_v19  ;;  %5514 = vmatpush3.bf16.msra.mxu1 %v5511_v10 }
  0x1a   : > { %5494 = vmatpush3.bf16.msra.mxu0 %v5491_v19 }
  0x1b   : > { %5496 = vmatprep.subr.bf16.mxu0 %v5495_v22 }
  0x1e   : > { %5498 = vmatpush3.bf16.msra.mxu0 %v5495_v22 }
  0x1f   : > { %5500 = vmatprep.subr.bf16.mxu0 %v5499_v25 }
  0x22   : > { %5502 = vmatpush3.bf16.msra.mxu0 %v5499_v25 }
  0x23   : > { %5504 = vmatprep.subr.bf16.mxu0 %v5503_v28 }
  0x26   : > { %5506 = vmatpush3.bf16.msra.mxu0 %v5503_v28 }
  0x90   : > { %v418_v31 = vpop.permute.xlu0 %417  ;;  %v424_v32 = vpop.permute.xlu1 %423 }
  0x91   : > { %vm428_vm0 = vcmp.eq.s32.totalorder %v418_v31, %v415_v30  ;;  %vm430_vm1 = vcmp.eq.s32.totalorder %v424_v32, %v415_v30  ;;  %v611_v32 = vrot.slane %v5919_v24, %v5922_v26 }
  0x92   : > { %5159 = vmatprep.mubr.msk.f32.mxu0 %vm428_vm0, %v5753_v33 }
  0x94   : > { %v421_v34 = vpop.permute.xlu0 %420  ;;  %v427_v35 = vpop.permute.xlu1 %426 }
  0x95   : > { %vm429_vm2 = vcmp.eq.s32.totalorder %v421_v34, %v415_v30  ;;  %vm431_vm3 = vcmp.eq.s32.totalorder %v427_v35, %v415_v30 }
  0x96   : > { %5160 = vmatmul.mubr.msk.f32.vlgmr.msra.gmra.mrb[0].mxu0 %vm429_vm2, %v5753_v33 }
  0x97   : > { %5162 = vmatprep.mubr.msk.f32.mxu0 %vm430_vm1, %v5753_v33 }
  0x9a   : > { %5163 = vmatmul.mubr.msk.f32.gmra.mrb[2].mxu0 %vm431_vm3, %v5753_v33 }
 0x169   : > { %v5161_v37 = vpop.f32.mrb[0].mxu0 }
 0x16a   : > { %v543_v38 = vadd.f32 %v5161_v37, %v541_v36  ;;  %v522_v39 = vpop.f32.mrb[1].mxu0 }
 0x16b   : > { %v542_v40 = vadd.f32 %v541_v36, %v522_v39 }
 0x16c   : > { %v550_v41 = vsel %vm546_vm4, %v543_v38, 0.0 }
 0x16d   : > { %551 = vadd.xlane.f32.xlu1 %v550_v41  ;;  %v5164_v42 = vpop.f32.mrb[2].mxu0  ;;  %v547_v43 = vsel %vm546_vm4, %v542_v40, 0.0 }
 0x16e   : > { %548 = vadd.xlane.f32.xlu0 %v547_v43  ;;  %v532_v44 = vpop.f32.mrb[3].mxu0  ;;  %v545_v45 = vadd.f32 %v5164_v42, %v541_v36 }
 0x16f   : > { %v544_v46 = vadd.f32 %v541_v36, %v532_v44 }
 0x170   : > { %v556_v48 = vsel %vm546_vm4, %v545_v45, 0.0 }
 0x171   : > { %v553_v47 = vsel %vm546_vm4, %v544_v46, 0.0 }
 0x172   : > { %554 = vadd.xlane.f32.xlu0 %v553_v47 }
 0x176   : > { %557 = vadd.xlane.f32.xlu0 %v556_v48 }
 0x1fa   : > { %v552_v49 = vpop.xlane.xlu1 %551 }
 0x1fb   : > { %v561_v50 = vmul.f32 0.03125, %v552_v49  ;;  %v549_v51 = vpop.xlane.xlu0 %548 }
 0x1fc   : > { %v560_v52 = vmul.f32 0.03125, %v549_v51 }
 0x1fd   : > { %v565_v53 = vsub.f32 %v543_v38, %v561_v50 }
 0x1fe   : > { %v564_v54 = vsub.f32 %v542_v40, %v560_v52 }
 0x1ff   : > { %v555_v55 = vpop.xlane.xlu0 %554  ;;  %v569_v56 = vmul.f32 %v565_v53, %v565_v53 }
 0x200   : > { %v562_v57 = vmul.f32 0.03125, %v555_v55  ;;  %v568_v58 = vmul.f32 %v564_v54, %v564_v54 }
 0x201   : > { %v575_v59 = vsel %vm546_vm4, %v569_v56, 0.0 }
 0x202   : > { %v566_v60 = vsub.f32 %v544_v46, %v562_v57  ;;  %576 = vadd.xlane.f32.xlu0 %v575_v59  ;;  %v572_v61 = vsel %vm546_vm4, %v568_v58, 0.0  ;;  %v5951_v46 = vsub.s32 2, %v5911_v18 }
 0x203   : > { %573 = vadd.xlane.f32.xlu1 %v572_v61  ;;  %v558_v62 = vpop.xlane.xlu0 %557  ;;  %v616_v61 = vld [vmem:[%s400_s21] sm:$0x1] }
 0x204   : > { %v563_v63 = vmul.f32 0.03125, %v558_v62  ;;  %v570_v0 = vmul.f32 %v566_v60, %v566_v60  ;;  %v651_v47 = vrot.slane %v5919_v24, %v5951_v46  ;;  %v620_v62 = vsub.f32 1.0, %v616_v61 }
 0x206   : > { %v567_v1 = vsub.f32 %v545_v45, %v563_v63  ;;  %v578_v2 = vsel %vm546_vm4, %v570_v0, 0.0  ;;  %v5754_v45 = vmov 0.0   ;;  %v617_v63 = vld [vmem:[%s400_s21 + $0x1] sm:$0x1]  ;;  %v624_v0 = vmul.f32 -1e+09, %v620_v62 }
 0x207   : > { %579 = vadd.xlane.f32.xlu1 %v578_v2  ;;  %5179 = vmatprep.subr.mxu1 %v5754_v45  ;;  %v618_v2 = vld [vmem:[%s400_s21 + $0x2] sm:$0x1] }
 0x208   : > { %v571_v3 = vmul.f32 %v567_v1, %v567_v1  ;;  %5209 = vmatprep.subr.mxu0 %v5754_v45  ;;  %5211 = vmatprep.mubr.msk.f32.mxu0 %vm5755_vm5, %v5754_v45  ;;  %v622_v5 = vsub.f32 1.0, %v618_v2 }
 0x20a   : > { %v581_v4 = vsel %vm546_vm4, %v571_v3, 0.0  ;;  %v6003_v3 = vrot.slane %v624_v0, %v5914_v23 }
 0x20b   : > { %582 = vadd.xlane.f32.xlu0 %v581_v4 }
 0x28f   : > { %v577_v11 = vpop.xlane.xlu0 %576 }
 0x290   : > { %v585_v12 = vmul.f32 0.03125, %v577_v11  ;;  %v574_v13 = vpop.xlane.xlu1 %573 }
 0x291   : > { %v584_v14 = vmul.f32 0.03125, %v574_v13  ;;  %v623_v13 = vsub.f32 1.0, %v619_v7 }
 0x292   : > { %v589_v15 = vadd.f32 1e-12, %v585_v12  ;;  %v626_v12 = vmul.f32 -1e+09, %v622_v5 }
 0x293   : > { %v588_v16 = vadd.f32 1e-12, %v584_v14 }
 0x294   : > { %5621 = vrsqrt.f32 %v589_v15  ;;  %v580_v17 = vpop.xlane.xlu1 %579 }
 0x295   : > { %5623 = vrsqrt.f32 %v588_v16  ;;  %v586_v19 = vmul.f32 0.03125, %v580_v17 }
 0x297   : > { %v590_v20 = vadd.f32 1e-12, %v586_v19 }
 0x298   : > { %v583_v21 = vpop.xlane.xlu0 %582 }
 0x299   : > { %5625 = vrsqrt.f32 %v590_v20  ;;  %v587_v22 = vmul.f32 0.03125, %v583_v21  ;;  %v6012_v20 = vrot.slane %v626_v12, %v5914_v23  ;;  %v627_v21 = vmul.f32 -1e+09, %v623_v13 }
 0x29b   : > { %v591_v25 = vadd.f32 1e-12, %v587_v22 }
 0x29d   : > { %5627 = vrsqrt.f32 %v591_v25 }
 0x29e   : > { %v5622_v28 = vpop.eup %5621 }
 0x29f   : > { %v5624_v29 = vpop.eup %5623  ;;  %v597_v30 = vmul.f32 %v5622_v28, %v565_v53 }
 0x2a0   : > { %v596_v31 = vmul.f32 %v5624_v29, %v564_v54 }
 0x2a1   : > { %v605_v33 = vmul.f32 %v603_v27, %v597_v30  ;;  %v6017_v30 = vrot.slane %v627_v21, %v5914_v23 }
 0x2a2   : > { %v604_v34 = vmul.f32 %v603_v27, %v596_v31 }
 0x2a3   : > { %v5626_v35 = vpop.eup %5625  ;;  %v5930_v38 = vadd.f32 %v611_v32, %v605_v33 }
 0x2a4   : > { %v5928_v36 = vadd.f32 %v611_v32, %v604_v34  ;;  %v598_v37 = vmul.f32 %v5626_v35, %v566_v60 }
 0x2a6   : > { %5173 = vmatprep.mubr.msk.f32.mxu1 %vm546_vm4, %v5928_v36  ;;  %v606_v39 = vmul.f32 %v603_v27, %v598_v37 }
 0x2a7   : > { %v5628_v40 = vpop.eup %5627  ;;  %5174 = vmatmul.mubr.msk.f32.vlgmr.msra.gmra.mrb[0].mxu1 %vm546_vm4, %v5930_v38 }
 0x2a8   : > { %v5936_v41 = vadd.f32 %v611_v32, %v606_v39  ;;  %v599_v42 = vmul.f32 %v5628_v40, %v567_v1  ;;  %v621_v1 = vsub.f32 1.0, %v617_v63 }
 0x2aa   : > { %5176 = vmatprep.mubr.msk.f32.mxu1 %vm546_vm4, %v5936_v41  ;;  %v607_v43 = vmul.f32 %v603_v27, %v599_v42  ;;  %v625_v4 = vmul.f32 -1e+09, %v621_v1 }
 0x2ac   : > { %v5940_v44 = vadd.f32 %v611_v32, %v607_v43  ;;  %v6007_v11 = vrot.slane %v625_v4, %v5914_v23 }
 0x2ae   : > { %5177 = vmatmul.mubr.msk.f32.gmra.mrb[2].mxu1 %vm546_vm4, %v5940_v44 }
 0x2af   : > { %5181 = vmatprep.mubr.msk.f32.mxu1 %vm5755_vm5, %v5754_v45 }
 0x37a   : > { %v5175_v48 = vpop.f32.mrb[0].mxu1 }
 0x37b   : > { %v5955_v49 = vadd.f32 %v5175_v48, %v651_v47  ;;  %v730_v50 = vpop.f32.mrb[1].mxu1 }
 0x37c   : > { %v5957_v51 = vadd.f32 %v730_v50, %v651_v47 }
 0x37d   : > { %828 = vrot.lane.b32.xlu0 %v5955_v49, %s5756_s15 }
 0x37e   : > { %750 = vrot.lane.b32.xlu1 %v5957_v51, %s5756_s15 }
 0x381   : > { %v5178_v52 = vpop.f32.mrb[2].mxu1 }
 0x382   : > { %v740_v53 = vpop.f32.mrb[3].mxu1  ;;  %v5967_v55 = vadd.f32 %v5178_v52, %v651_v47 }
 0x383   : > { %v5963_v54 = vadd.f32 %v740_v53, %v651_v47 }
 0x385   : > { %905 = vrot.lane.b32.xlu1 %v5963_v54, %s5756_s15 }
 0x389   : > { %982 = vrot.lane.b32.xlu1 %v5967_v55, %s5756_s15 }
 0x38d   : > { %1135 = vrot.lane.b32.xlu1 %v5957_v51, %s5757_s16 }
 0x3ef   : > { %v829_v57 = vpop.permute.xlu0 %828 }
 0x3f0   : > { %v751_v56 = vpop.permute.xlu1 %750 }
 0x3f1   : > { %5180 = vmatpush3.xpose.msk.msra.mxu1 %vm752_vm6, %v751_v56 }
 0x3f2   : > { %5184 = vmatprep.subr.mxu1 %v5754_v45 }
 0x3f4   : > { %5182 = vmatmul.mubr.msk.f32.vlgmr.msra.gmra.mrb[4].mxu1 %vm752_vm6, %v5957_v51 }
 0x3f5   : > { %5185 = vmatpush3.xpose.msk.msra.mxu1 %vm752_vm6, %v829_v57  ;;  %5186 = vmatprep.mubr.msk.f32.mxu1 %vm5755_vm5, %v5754_v45 }
 0x3f6   : > { %5189 = vmatprep.subr.mxu1 %v5754_v45 }
 0x3f7   : > { %v906_v58 = vpop.permute.xlu1 %905 }
 0x3f8   : > { %5187 = vmatmul.mubr.msk.f32.vlgmr.msra.gmra.mrb[6].mxu1 %vm752_vm6, %v5955_v49 }
 0x3f9   : > { %5190 = vmatpush3.xpose.msk.msra.mxu1 %vm752_vm6, %v906_v58  ;;  %5191 = vmatprep.mubr.msk.f32.mxu1 %vm5755_vm5, %v5754_v45 }
 0x3fa   : > { %5194 = vmatprep.subr.mxu1 %v5754_v45 }
 0x3fb   : > { %v983_v59 = vpop.permute.xlu1 %982 }
 0x3fc   : > { %5192 = vmatmul.mubr.msk.f32.vlgmr.msra.gmra.mrb[8].mxu1 %vm752_vm6, %v5963_v54 }
 0x3fd   : > { %5195 = vmatpush3.xpose.msk.msra.mxu1 %vm752_vm6, %v983_v59  ;;  %5196 = vmatprep.mubr.msk.f32.mxu1 %vm5755_vm5, %v5754_v45 }
 0x3fe   : > { %5199 = vmatprep.subr.mxu1 %v5754_v45 }
 0x3ff   : > { %v1136_v60 = vpop.permute.xlu1 %1135 }
 0x400   : > { %5197 = vmatmul.mubr.msk.f32.vlgmr.msra.gmra.mrb[10].mxu1 %vm752_vm6, %v5967_v55 }
 0x401   : > { %5200 = vmatpush3.msra.mxu1 %v1136_v60  ;;  %5201 = vmatprep.mubr.msk.f32.mxu1 %vm5755_vm5, %v5754_v45 }
 0x402   : > { %5204 = vmatprep.subr.mxu1 %v5754_v45 }
 0x4c7   : > { %v823_v6 = vpop.f32.mrb[4].mxu1 }
 0x4c8   : > { %v1058_v8 = vmul.f32 0.25, %v823_v6  ;;  %v5183_v9 = vpop.f32.mrb[5].mxu1 }
 0x4ca   : > { %v1086_v10 = vadd.f32 %v6003_v3, %v1058_v8 }
 0x4cb   : > { %v900_v14 = vpop.f32.mrb[6].mxu1 }
 0x4cc   : > { %v1059_v15 = vmul.f32 0.25, %v900_v14  ;;  %v5188_v16 = vpop.f32.mrb[7].mxu1  ;;  %v1091_v17 = vsel %vm1090_vm7, %v1086_v10, -inf }
 0x4cd   : > { %1092 = vmax.xlane.f32.xlu0 %v1091_v17 }
 0x4ce   : > { %v1087_v19 = vadd.f32 %v6007_v11, %v1059_v15 }
 0x4cf   : > { %v977_v22 = vpop.f32.mrb[8].mxu1 }
 0x4d0   : > { %v1060_v25 = vmul.f32 0.25, %v977_v22  ;;  %v5193_v27 = vpop.f32.mrb[9].mxu1  ;;  %v1094_v28 = vsel %vm1090_vm7, %v1087_v19, -inf }
 0x4d1   : > { %1095 = vmax.xlane.f32.xlu1 %v1094_v28 }
 0x4d2   : > { %v1088_v29 = vadd.f32 %v6012_v20, %v1060_v25 }
 0x4d3   : > { %v1054_v31 = vpop.f32.mrb[10].mxu1 }
 0x4d4   : > { %v1061_v32 = vmul.f32 0.25, %v1054_v31  ;;  %v5198_v33 = vpop.f32.mrb[11].mxu1  ;;  %v1097_v34 = vsel %vm1090_vm7, %v1088_v29, -inf }
 0x4d5   : > { %1098 = vmax.xlane.f32.xlu0 %v1097_v34 }
 0x4d6   : > { %v1089_v35 = vadd.f32 %v6017_v30, %v1061_v32 }
 0x4d8   : > { %v1100_v37 = vsel %vm1090_vm7, %v1089_v35, -inf }
 0x4d9   : > { %1101 = vmax.xlane.f32.xlu0 %v1100_v37 }
 0x4e2   : > { %1287 = vrot.lane.b32.xlu1 %v5963_v54, %s5757_s16 }
 0x4e6   : > { %1363 = vrot.lane.b32.xlu1 %v5967_v55, %s5757_s16 }
 0x4ef   : > { %1211 = vrot.lane.b32.xlu0 %v5955_v49, %s5757_s16 }
 0x55a   : > { %v1093_v39 = vpop.xlane.xlu0 %1092 }
 0x55b   : > { %v1103_v40 = vsub.f32 %v1086_v10, %v1093_v39 }
 0x55d   : > { %v1107_v42 = vmul.f32 1.442695, %v1103_v40 }
 0x55e   : > { %v1096_v43 = vpop.xlane.xlu1 %1095 }
 0x55f   : > { %5629 = vpow2.f32 %v1107_v42  ;;  %v1104_v47 = vsub.f32 %v1087_v19, %v1096_v43 }
 0x561   : > { %v1109_v48 = vmul.f32 1.442695, %v1104_v47 }
 0x562   : > { %v1288_v50 = vpop.permute.xlu1 %1287  ;;  %v1099_v58 = vpop.xlane.xlu0 %1098 }
 0x563   : > { %5631 = vpow2.f32 %v1109_v48  ;;  %5210 = vmatpush3.msra.mxu0 %v1288_v50  ;;  %v1105_v59 = vsub.f32 %v1088_v29, %v1099_v58 }
 0x564   : > { %5219 = vmatprep.subr.mxu0 %v5754_v45 }
 0x565   : > { %v1111_v61 = vmul.f32 1.442695, %v1105_v59 }
 0x566   : > { %v1102_v60 = vpop.xlane.xlu0 %1101  ;;  %v1364_v5 = vpop.permute.xlu1 %1363 }
 0x567   : > { %v1106_v62 = vsub.f32 %v1089_v35, %v1102_v60  ;;  %5633 = vpow2.f32 %v1111_v61 }
 0x569   : > { %v5630_v52 = vpop.eup %5629  ;;  %v1113_v63 = vmul.f32 1.442695, %v1106_v62 }
 0x56a   : > { %v1115_v53 = vsel %vm1090_vm7, %v5630_v52, 0.0  ;;  %v1212_v6 = vpop.permute.xlu0 %1211 }
 0x56b   : > { %1116 = vadd.xlane.f32.xlu1 %v1115_v53  ;;  %5635 = vpow2.f32 %v1113_v63 }
 0x56d   : > { %v5632_v56 = vpop.eup %5631 }
 0x56e   : > { %v1118_v57 = vsel %vm1090_vm7, %v5632_v56, 0.0 }
 0x56f   : > { %1119 = vadd.xlane.f32.xlu0 %v1118_v57 }
 0x571   : > { %v5634_v0 = vpop.eup %5633 }
 0x572   : > { %v1121_v1 = vsel %vm1090_vm7, %v5634_v0, 0.0 }
 0x575   : > { %v5636_v2 = vpop.eup %5635 }
 0x576   : > { %v1124_v4 = vsel %vm1090_vm7, %v5636_v2, 0.0 }
 0x57c   : > { %1519 = vrot.lane.b32.xlu1 %v5955_v49, %s5758_s22 }
 0x585   : > { %1441 = vrot.lane.b32.xlu0 %v5957_v51, %s5758_s22 }
 0x5a0   : > { %1122 = vadd.xlane.f32.xlu1 %v1121_v1 }
 0x5a4   : > { %1125 = vadd.xlane.f32.xlu0 %v1124_v4 }
 0x5b1   : > { %1517 = vrot.lane.b32.xlu1 %v5955_v49, %s5759_s23 }
 0x5b5   : > { %1675 = vrot.lane.b32.xlu1 %v5967_v55, %s5758_s22 }
 0x5b9   : > { %1673 = vrot.lane.b32.xlu1 %v5967_v55, %s5759_s23 }
 0x5ba   : > { %1439 = vrot.lane.b32.xlu0 %v5957_v51, %s5759_s23 }
 0x5be   : > { %1597 = vrot.lane.b32.xlu0 %v5963_v54, %s5758_s22 }
 0x5c2   : > { %1595 = vrot.lane.b32.xlu0 %v5963_v54, %s5759_s23 }
 0x5f8   : > { %v1117_v7 = vpop.xlane.xlu1 %1116 }
 0x5f9   : > { %5637 = vrcp.f32 %v1117_v7 }
 0x5fc   : > { %v1120_v8 = vpop.xlane.xlu0 %1119  ;;  %v1520_v14 = vpop.permute.xlu1 %1519 }
 0x5fd   : > { %5639 = vrcp.f32 %v1120_v8 }
 0x600   : > { %v1442_v15 = vpop.permute.xlu0 %1441 }
 0x603   : > { %v5638_v9 = vpop.eup %5637 }
 0x604   : > { %v1131_v10 = vmul.f32 %v5638_v9, %v5630_v52 }
 0x606   : > { %5202 = vmatmul.mubr.msk.f32.vlgmr.msra.gmra.mrb[12].mxu1 %vm1090_vm7, %v1131_v10 }
 0x607   : > { %v5640_v12 = vpop.eup %5639  ;;  %5205 = vmatpush3.msra.mxu1 %v1212_v6  ;;  %5206 = vmatprep.mubr.msk.f32.mxu1 %vm5755_vm5, %v5754_v45 }
 0x608   : > { %5214 = vmatprep.subr.mxu1 %v5754_v45  ;;  %v1132_v13 = vmul.f32 %v5640_v12, %v5632_v56 }
 0x60a   : > { %5207 = vmatmul.mubr.msk.f32.vlgmr.msra.gmra.mrb[14].mxu1 %vm1090_vm7, %v1132_v13 }
 0x60b   : > { %5215 = vmatpush3.msra.mxu1 %v1364_v5  ;;  %5216 = vmatprep.mubr.msk.f32.mxu1 %vm5755_vm5, %v5754_v45 }
 0x60c   : > { %5224 = vmatprep.subr.mxu1 %v5754_v45 }
 0x62d   : > { %v1123_v16 = vpop.xlane.xlu1 %1122 }
 0x62e   : > { %5641 = vrcp.f32 %v1123_v16 }
 0x631   : > { %v1126_v17 = vpop.xlane.xlu0 %1125  ;;  %v1518_v25 = vpop.permute.xlu1 %1517 }
 0x632   : > { %5643 = vrcp.f32 %v1126_v17 }
 0x635   : > { %v1440_v19 = vpop.permute.xlu0 %1439  ;;  %v1676_v31 = vpop.permute.xlu1 %1675 }
 0x638   : > { %v5642_v21 = vpop.eup %5641 }
 0x639   : > { %v1133_v22 = vmul.f32 %v5642_v21, %v5634_v0  ;;  %v1598_v28 = vpop.permute.xlu0 %1597  ;;  %v1674_v33 = vpop.permute.xlu1 %1673 }
 0x63b   : > { %5212 = vmatmul.mubr.msk.f32.vlgmr.msra.gmra.mrb[4].mxu0 %vm1090_vm7, %v1133_v22 }
 0x63c   : > { %v5644_v27 = vpop.eup %5643  ;;  %5220 = vmatpush3.xpose.msk.msra.mxu0 %vm752_vm6, %v1442_v15  ;;  %5221 = vmatprep.mubr.msk.f32.mxu0 %vm5755_vm5, %v5754_v45 }
 0x63d   : > { %v1134_v29 = vmul.f32 %v5644_v27, %v5636_v2  ;;  %5229 = vmatprep.subr.mxu0 %v5754_v45  ;;  %v1596_v32 = vpop.permute.xlu0 %1595 }
 0x63f   : > { %5217 = vmatmul.mubr.msk.f32.vlgmr.msra.gmra.mrb[16].mxu1 %vm1090_vm7, %v1134_v29  ;;  %5222 = vmatmul.mubr.msk.f32.vlgmr.msra.gmra.mrb[6].mxu0 %vm752_vm6, %v1440_v19 }
 0x640   : > { %5225 = vmatpush3.xpose.msk.msra.mxu1 %vm752_vm6, %v1520_v14  ;;  %5230 = vmatpush3.xpose.msk.msra.mxu0 %vm752_vm6, %v1598_v28 }
 0x641   : > { %5226 = vmatprep.mubr.msk.f32.mxu1 %vm5755_vm5, %v5754_v45  ;;  %5231 = vmatprep.mubr.msk.f32.mxu0 %vm5755_vm5, %v5754_v45 }
 0x642   : > { %5234 = vmatprep.subr.mxu1 %v5754_v45  ;;  %5239 = vmatprep.subr.mxu0 %v5754_v45 }
 0x643   : > { %5227 = vmatmul.mubr.msk.f32.vlgmr.msra.gmra.mrb[18].mxu1 %vm752_vm6, %v1518_v25  ;;  %5232 = vmatmul.mubr.msk.f32.vlgmr.msra.gmra.mrb[8].mxu0 %vm752_vm6, %v1596_v32 }
 0x644   : > { %5235 = vmatpush3.xpose.msk.msra.mxu1 %vm752_vm6, %v1676_v31  ;;  %5236 = vmatprep.mubr.msk.f32.mxu1 %vm5755_vm5, %v5754_v45 }
 0x645   : > { %5244 = vmatprep.subr.mxu1 %v5754_v45  ;;  %5241 = vmatprep.mubr.msk.f32.mxu0 %vm5755_vm5, %v5754_v45 }
 0x647   : > { %5237 = vmatmul.mubr.msk.f32.vlgmr.msra.gmra.mrb[20].mxu1 %vm752_vm6, %v1674_v33 }
 0x648   : > { %5246 = vmatprep.mubr.msk.f32.mxu1 %vm5755_vm5, %v5754_v45 }
 0x6d9   : > { %v6083_v34 = vpop.f32.mrb[12].mxu1 }
 0x6da   : > { %v5203_v35 = vpop.f32.mrb[13].mxu1 }
 0x6dd   : > { %v6085_v37 = vpop.f32.mrb[14].mxu1 }
 0x6de   : > { %v5208_v39 = vpop.f32.mrb[15].mxu1 }
 0x70e   : > { %v6087_v40 = vpop.f32.mrb[4].mxu0 }
 0x70f   : > { %v5213_v42 = vpop.f32.mrb[5].mxu0 }
 0x712   : > { %v6089_v43 = vpop.f32.mrb[16].mxu1  ;;  %v1513_v47 = vpop.f32.mrb[6].mxu0 }
 0x713   : > { %v1751_v48 = vmul.f32 0.25, %v1513_v47  ;;  %v5218_v50 = vpop.f32.mrb[17].mxu1  ;;  %v5223_v52 = vpop.f32.mrb[7].mxu0 }
 0x715   : > { %v1755_v53 = vadd.f32 %v1751_v48, %v6003_v3 }
 0x716   : > { %v1591_v56 = vpop.f32.mrb[18].mxu1  ;;  %v1669_v57 = vpop.f32.mrb[8].mxu0 }
 0x717   : > { %v1752_v58 = vmul.f32 0.25, %v1591_v56  ;;  %v1753_v59 = vmul.f32 0.25, %v1669_v57  ;;  %v5228_v60 = vpop.f32.mrb[19].mxu1  ;;  %v5233_v61 = vpop.f32.mrb[9].mxu0  ;;  %v1759_v62 = vsel %vm1090_vm7, %v1755_v53, -inf }
 0x718   : > { %1760 = vmax.xlane.f32.xlu0 %v1759_v62  ;;  %v632_v62 = vld [vmem:[%s6620_s6] sm:$0xff] }
 0x719   : > { %v1756_v63 = vadd.f32 %v1752_v58, %v6007_v11  ;;  %v1757_v0 = vadd.f32 %v1753_v59, %v6012_v20 }
 0x71a   : > { %v1747_v1 = vpop.f32.mrb[20].mxu1 }
 0x71b   : > { %v1754_v2 = vmul.f32 0.25, %v1747_v1  ;;  %v5238_v4 = vpop.f32.mrb[21].mxu1  ;;  %v1762_v5 = vsel %vm1090_vm7, %v1756_v63, -inf  ;;  %v1765_v6 = vsel %vm1090_vm7, %v1757_v0, -inf  ;;  %v634_v1 = vld [vmem:[%s6620_s6 + $0x10] sm:$0xff] }
 0x71c   : > { %1763 = vmax.xlane.f32.xlu1 %v1762_v5  ;;  %1766 = vmax.xlane.f32.xlu0 %v1765_v6 }
 0x71d   : > { %v1758_v7 = vadd.f32 %v1754_v2, %v6017_v30  ;;  %v635_v2 = vld [vmem:[%s6620_s6 + $0x18] sm:$0xff] }
 0x71e   : > { %v5519_v4 = vpack.c.bf16 %v635_v2, %v634_v1 }
 0x71f   : > { %v1768_v8 = vsel %vm1090_vm7, %v1758_v7, -inf }
 0x720   : > { %1769 = vmax.xlane.f32.xlu0 %v1768_v8 }
 0x72d   : > { %1803 = vrot.lane.b32.xlu1 %v5957_v51, %s5760_s24 }
 0x7a5   : > { %v1761_v9 = vpop.xlane.xlu0 %1760 }
 0x7a6   : > { %v1771_v10 = vsub.f32 %v1755_v53, %v1761_v9 }
 0x7a8   : > { %v1775_v12 = vmul.f32 1.442695, %v1771_v10 }
 0x7a9   : > { %v1764_v13 = vpop.xlane.xlu1 %1763  ;;  %v1767_v14 = vpop.xlane.xlu0 %1766 }
 0x7aa   : > { %5645 = vpow2.f32 %v1775_v12  ;;  %v1772_v15 = vsub.f32 %v1756_v63, %v1764_v13  ;;  %v1773_v16 = vsub.f32 %v1757_v0, %v1767_v14  ;;  %v633_v63 = vld [vmem:[%s6620_s6 + $0x8] sm:$0xff] }
 0x7ab   : > { %v5515_v0 = vpack.c.bf16 %v633_v63, %v632_v62 }
 0x7ac   : > { %v1777_v17 = vmul.f32 1.442695, %v1772_v15  ;;  %v1779_v19 = vmul.f32 1.442695, %v1773_v16 }
 0x7ad   : > { %v1804_v21 = vpop.permute.xlu1 %1803  ;;  %v1770_v22 = vpop.xlane.xlu0 %1769 }
 0x7ae   : > { %5647 = vpow2.f32 %v1777_v17  ;;  %v1774_v25 = vsub.f32 %v1758_v7, %v1770_v22  ;;  %5240 = vmatpush3.msra.mxu0 %v1804_v21 }
 0x7af   : > { %5649 = vpow2.f32 %v1779_v19  ;;  %5249 = vmatprep.subr.mxu0 %v5754_v45 }
 0x7b0   : > { %v1781_v27 = vmul.f32 1.442695, %v1774_v25 }
 0x7b2   : > { %5651 = vpow2.f32 %v1781_v27 }
 0x7b4   : > { %v5646_v51 = vpop.eup %5645 }
 0x7b5   : > { %v1783_v28 = vsel %vm1090_vm7, %v5646_v51, 0.0 }
 0x7b6   : > { %1784 = vadd.xlane.f32.xlu1 %v1783_v28 }
 0x7b8   : > { %v5648_v29 = vpop.eup %5647 }
 0x7b9   : > { %v5650_v31 = vpop.eup %5649  ;;  %v1786_v32 = vsel %vm1090_vm7, %v5648_v29, 0.0 }
 0x7ba   : > { %1787 = vadd.xlane.f32.xlu0 %v1786_v32  ;;  %v1789_v33 = vsel %vm1090_vm7, %v5650_v31, 0.0 }
 0x7bb   : > { %1790 = vadd.xlane.f32.xlu1 %v1789_v33 }
 0x7bc   : > { %v5652_v35 = vpop.eup %5651 }
 0x7bd   : > { %v1792_v39 = vsel %vm1090_vm7, %v5652_v35, 0.0 }
 0x7be   : > { %1793 = vadd.xlane.f32.xlu0 %v1792_v39 }
 0x7cc   : > { %1955 = vrot.lane.b32.xlu1 %v5963_v54, %s5760_s24 }
 0x7d0   : > { %2031 = vrot.lane.b32.xlu1 %v5967_v55, %s5760_s24 }
 0x7d4   : > { %1879 = vrot.lane.b32.xlu0 %v5955_v49, %s5760_s24 }
 0x843   : > { %v1785_v42 = vpop.xlane.xlu1 %1784 }
 0x844   : > { %5653 = vrcp.f32 %v1785_v42 }
 0x847   : > { %v1788_v47 = vpop.xlane.xlu0 %1787 }
 0x848   : > { %v1791_v48 = vpop.xlane.xlu1 %1790  ;;  %5655 = vrcp.f32 %v1788_v47 }
 0x849   : > { %5657 = vrcp.f32 %v1791_v48 }
 0x84b   : > { %v1794_v50 = vpop.xlane.xlu0 %1793 }
 0x84c   : > { %5659 = vrcp.f32 %v1794_v50  ;;  %v1956_v56 = vpop.permute.xlu1 %1955 }
 0x84e   : > { %v5654_v52 = vpop.eup %5653 }
 0x84f   : > { %v1799_v53 = vmul.f32 %v5654_v52, %v5646_v51  ;;  %v1880_v57 = vpop.permute.xlu0 %1879 }
 0x850   : > { %5245 = vmatpush3.msra.mxu1 %v1880_v57  ;;  %v2032_v59 = vpop.permute.xlu1 %2031 }
 0x851   : > { %5242 = vmatmul.mubr.msk.f32.vlgmr.msra.gmra.mrb[10].mxu0 %vm1090_vm7, %v1799_v53  ;;  %5254 = vmatprep.subr.mxu1 %v5754_v45 }
 0x852   : > { %v5656_v54 = vpop.eup %5655  ;;  %5250 = vmatpush3.msra.mxu0 %v1956_v56  ;;  %5251 = vmatprep.mubr.msk.f32.mxu0 %vm5755_vm5, %v5754_v45 }
 0x853   : > { %v5658_v49 = vpop.eup %5657  ;;  %v1800_v55 = vmul.f32 %v5656_v54, %v5648_v29  ;;  %5516 = vmatprep.subr.bf16.mxu0 %v5515_v0 }
 0x854   : > { %v1801_v58 = vmul.f32 %v5658_v49, %v5650_v31 }
 0x855   : > { %5247 = vmatmul.mubr.msk.f32.vlgmr.msra.gmra.mrb[22].mxu1 %vm1090_vm7, %v1800_v55 }
 0x856   : > { %v5660_v60 = vpop.eup %5659  ;;  %5252 = vmatmul.mubr.msk.f32.vlgmr.msra.gmra.mrb[12].mxu0 %vm1090_vm7, %v1801_v58  ;;  %5255 = vmatpush3.msra.mxu1 %v2032_v59 }
 0x857   : > { %v1802_v61 = vmul.f32 %v5660_v60, %v5652_v35  ;;  %5256 = vmatprep.mubr.msk.f32.mxu1 %vm5755_vm5, %v5754_v45  ;;  %5518 = vmatpush3.bf16.msra.mxu0 %v5515_v0 }
 0x858   : > { %5520 = vmatprep.subr.bf16.mxu0 %v5519_v4 }
 0x859   : > { %5257 = vmatmul.mubr.msk.f32.vlgmr.msra.gmra.mrb[24].mxu1 %vm1090_vm7, %v1802_v61 }
 0x85b   : > { %5522 = vmatpush3.bf16.msra.mxu0 %v5519_v4 }
 0x924   : > { %v1875_v5 = vpop.f32.mrb[10].mxu0 }
 0x925   : > { %v5243_v6 = vpop.f32.mrb[11].mxu0  ;;  %2111 = vrot.lane.b32.xlu0 %v1875_v5, %s5761_s14  ;;  %v636_v5 = vld [vmem:[%s6621_s7] sm:$0xff] }
 0x926   : > { %v637_v6 = vld [vmem:[%s6621_s7 + $0x8] sm:$0xff] }
 0x928   : > { %v1951_v7 = vpop.f32.mrb[22].mxu1 }
 0x929   : > { %v2027_v8 = vpop.f32.mrb[12].mxu0  ;;  %2113 = vrot.lane.b32.xlu1 %v1951_v7, %s5761_s14  ;;  %v5248_v9 = vpop.f32.mrb[23].mxu1  ;;  %v5523_v7 = vpack.c.bf16 %v637_v6, %v636_v5 }
 0x92a   : > { %v5253_v10 = vpop.f32.mrb[13].mxu0  ;;  %2115 = vrot.lane.b32.xlu0 %v2027_v8, %s5761_s14  ;;  %v638_v8 = vld [vmem:[%s6621_s7 + $0x10] sm:$0xff]  ;;  %v639_v9 = vld [vmem:[%s6621_s7 + $0x18] sm:$0xff] }
 0x92b   : > { %5524 = vmatprep.subr.bf16.mxu1 %v5523_v7  ;;  %v5527_v10 = vpack.c.bf16 %v639_v9, %v638_v8 }
 0x92c   : > { %v2103_v12 = vpop.f32.mrb[24].mxu1  ;;  %5526 = vmatpush3.bf16.msra.mxu1 %v5523_v7 }
 0x92d   : > { %2117 = vrot.lane.b32.xlu1 %v2103_v12, %s5761_s14  ;;  %v5258_v13 = vpop.f32.mrb[25].mxu1  ;;  %5528 = vmatprep.subr.bf16.mxu1 %v5527_v10 }
 0x930   : > { %5530 = vmatpush3.bf16.msra.mxu1 %v5527_v10 }
 0x997   : > { %v2112_v14 = vpop.permute.xlu0 %2111 }
 0x998   : > { %v2123_v15 = vsel %vm752_vm6, %v6083_v34, %v2112_v14  ;;  %v6150_v34 = vsub.s32 3, %v5911_v18 }
 0x999   : > { %5267 = vmatprep.mubr.msk.f32.mxu0 %vm546_vm4, %v2123_v15 }
 0x99b   : > { %v2114_v16 = vpop.permute.xlu1 %2113 }
 0x99c   : > { %v2124_v17 = vsel %vm752_vm6, %v6085_v37, %v2114_v16  ;;  %v2116_v19 = vpop.permute.xlu0 %2115  ;;  %v2130_v37 = vrot.slane %v5919_v24, %v6150_v34 }
 0x99d   : > { %v2125_v21 = vsel %vm752_vm6, %v6087_v40, %v2116_v19  ;;  %5268 = vmatmul.mubr.msk.f32.vlgmr.msra.gmra.mrb[14].mxu0 %vm546_vm4, %v2124_v17 }
 0x99e   : > { %5270 = vmatprep.mubr.msk.f32.mxu0 %vm546_vm4, %v2125_v21 }
 0x99f   : > { %v2118_v22 = vpop.permute.xlu1 %2117 }
 0x9a0   : > { %v2126_v25 = vsel %vm752_vm6, %v6089_v43, %v2118_v22 }
 0x9a1   : > { %5271 = vmatmul.mubr.msk.f32.gmra.mrb[16].mxu0 %vm546_vm4, %v2126_v25 }
 0xa70   : > { %v5269_v27 = vpop.f32.mrb[14].mxu0 }
 0xa71   : > { %v2215_v51 = vadd.f32 %v5269_v27, %v2130_v37  ;;  %v2209_v28 = vpop.f32.mrb[15].mxu0  ;;  %v2286_v27 = vsub.s32 4, %v5911_v18 }
 0xa72   : > { %v2210_v40 = vadd.f32 %v2209_v28, %v2130_v37  ;;  %v2294_v28 = vsub.s32 5, %v5911_v18 }
 0xa73   : > { %v2229_v29 = vadd.f32 %v2215_v51, %v5930_v38 }
 0xa74   : > { %v5272_v31 = vpop.f32.mrb[16].mxu0  ;;  %v2228_v32 = vadd.f32 %v2210_v40, %v5928_v36  ;;  %v2287_v40 = vrot.slane %v5919_v24, %v2286_v27 }
 0xa75   : > { %v2219_v33 = vpop.f32.mrb[17].mxu0  ;;  %v2235_v43 = vsel %vm546_vm4, %v2229_v29, 0.0  ;;  %v2225_v35 = vadd.f32 %v5272_v31, %v2130_v37 }
 0xa76   : > { %v2220_v39 = vadd.f32 %v2219_v33, %v2130_v37  ;;  %2236 = vadd.xlane.f32.xlu1 %v2235_v43  ;;  %v2232_v42 = vsel %vm546_vm4, %v2228_v32, 0.0  ;;  %v2295_v43 = vrot.slane %v5919_v24, %v2294_v28 }
 0xa77   : > { %2233 = vadd.xlane.f32.xlu0 %v2232_v42  ;;  %v2231_v50 = vadd.f32 %v2225_v35, %v5940_v44 }
 0xa78   : > { %v2230_v47 = vadd.f32 %v2220_v39, %v5936_v41 }
 0xa79   : > { %v2241_v38 = vsel %vm546_vm4, %v2231_v50, 0.0 }
 0xa7a   : > { %v2238_v48 = vsel %vm546_vm4, %v2230_v47, 0.0 }
 0xa7b   : > { %2239 = vadd.xlane.f32.xlu0 %v2238_v48 }
 0xa7f   : > { %2242 = vadd.xlane.f32.xlu0 %v2241_v38 }
 0xb03   : > { %v2237_v36 = vpop.xlane.xlu1 %2236 }
 0xb04   : > { %v2245_v52 = vmul.f32 0.03125, %v2237_v36  ;;  %v2234_v53 = vpop.xlane.xlu0 %2233 }
 0xb05   : > { %v2244_v56 = vmul.f32 0.03125, %v2234_v53 }
 0xb06   : > { %v2249_v57 = vsub.f32 %v2229_v29, %v2245_v52 }
 0xb07   : > { %v2248_v54 = vsub.f32 %v2228_v32, %v2244_v56 }
 0xb08   : > { %v2240_v49 = vpop.xlane.xlu0 %2239  ;;  %v2253_v55 = vmul.f32 %v2249_v57, %v2249_v57 }
 0xb09   : > { %v2246_v58 = vmul.f32 0.03125, %v2240_v49  ;;  %v2252_v59 = vmul.f32 %v2248_v54, %v2248_v54  ;;  %v641_v49 = vld [vmem:[%s6622_s8 + $0x8] sm:$0xff] }
 0xb0a   : > { %v2259_v41 = vsel %vm546_vm4, %v2253_v55, 0.0 }
 0xb0b   : > { %v2250_v60 = vsub.f32 %v2230_v47, %v2246_v58  ;;  %2260 = vadd.xlane.f32.xlu0 %v2259_v41  ;;  %v2256_v44 = vsel %vm546_vm4, %v2252_v59, 0.0  ;;  %v642_v58 = vld [vmem:[%s6622_s8 + $0x10] sm:$0xff]  ;;  %v643_v59 = vld [vmem:[%s6622_s8 + $0x18] sm:$0xff] }
 0xb0c   : > { %2257 = vadd.xlane.f32.xlu1 %v2256_v44  ;;  %v2243_v61 = vpop.xlane.xlu0 %2242  ;;  %v5535_v41 = vpack.c.bf16 %v643_v59, %v642_v58  ;;  %v645_v44 = vld [vmem:[%s6622_s8 + $0x28] sm:$0xff] }
 0xb0d   : > { %v2247_v62 = vmul.f32 0.03125, %v2243_v61  ;;  %v2254_v63 = vmul.f32 %v2250_v60, %v2250_v60 }
 0xb0f   : > { %v2251_v0 = vsub.f32 %v2231_v50, %v2247_v62  ;;  %v2262_v1 = vsel %vm546_vm4, %v2254_v63, 0.0  ;;  %v646_v62 = vld [vmem:[%s6622_s8 + $0x30] sm:$0xff]  ;;  %v647_v63 = vld [vmem:[%s6622_s8 + $0x38] sm:$0xff] }
 0xb10   : > { %2263 = vadd.xlane.f32.xlu1 %v2262_v1  ;;  %v2302_v1 = vsub.s32 6, %v5911_v18 }
 0xb11   : > { %v2255_v2 = vmul.f32 %v2251_v0, %v2251_v0 }
 0xb13   : > { %v2265_v4 = vsel %vm546_vm4, %v2255_v2, 0.0  ;;  %v2303_v2 = vrot.slane %v5919_v24, %v2302_v1 }
 0xb14   : > { %2266 = vadd.xlane.f32.xlu0 %v2265_v4 }
 0xb98   : > { %v2261_v12 = vpop.xlane.xlu0 %2260 }
 0xb99   : > { %v2269_v13 = vmul.f32 0.03125, %v2261_v12  ;;  %v2258_v14 = vpop.xlane.xlu1 %2257 }
 0xb9a   : > { %v2268_v15 = vmul.f32 0.03125, %v2258_v14 }
 0xb9b   : > { %v2273_v16 = vadd.f32 1e-12, %v2269_v13 }
 0xb9c   : > { %v2272_v17 = vadd.f32 1e-12, %v2268_v15 }
 0xb9d   : > { %5661 = vrsqrt.f32 %v2273_v16  ;;  %v2264_v19 = vpop.xlane.xlu1 %2263 }
 0xb9e   : > { %5663 = vrsqrt.f32 %v2272_v17  ;;  %v2270_v21 = vmul.f32 0.03125, %v2264_v19 }
 0xba0   : > { %v2274_v22 = vadd.f32 1e-12, %v2270_v21 }
 0xba1   : > { %v2267_v25 = vpop.xlane.xlu0 %2266 }
 0xba2   : > { %5665 = vrsqrt.f32 %v2274_v22  ;;  %v2271_v37 = vmul.f32 0.03125, %v2267_v25 }
 0xba4   : > { %v2275_v51 = vadd.f32 1e-12, %v2271_v37 }
 0xba6   : > { %5667 = vrsqrt.f32 %v2275_v51 }
 0xba7   : > { %v5662_v29 = vpop.eup %5661 }
 0xba8   : > { %v5664_v31 = vpop.eup %5663  ;;  %v2281_v32 = vmul.f32 %v5662_v29, %v2249_v57 }
 0xba9   : > { %v2280_v33 = vmul.f32 %v5664_v31, %v2248_v54  ;;  %v640_v54 = vld [vmem:[%s6622_s8] sm:$0xff] }
 0xbaa   : > { %v2289_v35 = vmul.f32 %v2287_v40, %v2281_v32  ;;  %v5531_v55 = vpack.c.bf16 %v641_v49, %v640_v54 }
 0xbab   : > { %v2288_v39 = vmul.f32 %v2287_v40, %v2280_v33 }
 0xbac   : > { %v5666_v42 = vpop.eup %5665  ;;  %v6188_v50 = vadd.f32 %v2295_v43, %v2289_v35  ;;  %5532 = vmatprep.subr.bf16.mxu0 %v5531_v55 }
 0xbad   : > { %v6186_v47 = vadd.f32 %v2295_v43, %v2288_v39  ;;  %v2282_v48 = vmul.f32 %v5666_v42, %v2250_v60  ;;  %5534 = vmatpush3.bf16.msra.mxu0 %v5531_v55  ;;  %v644_v60 = vld [vmem:[%s6622_s8 + $0x20] sm:$0xff] }
 0xbae   : > { %5536 = vmatprep.subr.bf16.mxu0 %v5535_v41  ;;  %v5539_v61 = vpack.c.bf16 %v645_v44, %v644_v60 }
 0xbaf   : > { %5281 = vmatprep.mubr.msk.f32.mxu1 %vm546_vm4, %v6186_v47  ;;  %v2290_v38 = vmul.f32 %v2287_v40, %v2282_v48 }
 0xbb0   : > { %v5668_v36 = vpop.eup %5667  ;;  %5282 = vmatmul.mubr.msk.f32.vlgmr.msra.gmra.mrb[26].mxu1 %vm546_vm4, %v6188_v50 }
 0xbb1   : > { %v6194_v52 = vadd.f32 %v2295_v43, %v2290_v38  ;;  %v2283_v53 = vmul.f32 %v5668_v36, %v2251_v0  ;;  %5538 = vmatpush3.bf16.msra.mxu0 %v5535_v41  ;;  %v5543_v0 = vpack.c.bf16 %v647_v63, %v646_v62  ;;  %v2439_v63 = vsub.s32 7, %v5911_v18 }
 0xbb2   : > { %5540 = vmatprep.subr.bf16.mxu0 %v5539_v61 }
 0xbb3   : > { %5284 = vmatprep.mubr.msk.f32.mxu1 %vm546_vm4, %v6194_v52  ;;  %v2291_v56 = vmul.f32 %v2287_v40, %v2283_v53 }
 0xbb5   : > { %v6198_v57 = vadd.f32 %v2295_v43, %v2291_v56  ;;  %5542 = vmatpush3.bf16.msra.mxu0 %v5539_v61 }
 0xbb6   : > { %5544 = vmatprep.subr.bf16.mxu0 %v5543_v0 }
 0xbb7   : > { %5285 = vmatmul.mubr.msk.f32.gmra.mrb[28].mxu1 %vm546_vm4, %v6198_v57 }
 0xbb9   : > { %5546 = vmatpush3.bf16.msra.mxu0 %v5543_v0  ;;  %v5743_v0 = vld [vmem:[%s6618_s4] sm:$0xff] }
 0xbba   : > { %5333 = vmatprep.subr.mxu0 %v5754_v45 }
 0xc83   : > { %v5283_v4 = vpop.f32.mrb[26].mxu1 }
 0xc84   : > { %v2388_v5 = vadd.f32 %v5283_v4, %v2303_v2  ;;  %v2382_v6 = vpop.f32.mrb[27].mxu1 }
 0xc85   : > { %v2383_v7 = vadd.f32 %v2382_v6, %v2303_v2 }
 0xc86   : > { %v2402_v8 = vmul.f32 %v2388_v5, %v2388_v5 }
 0xc87   : > { %v2401_v9 = vmul.f32 %v2383_v7, %v2383_v7 }
 0xc88   : > { %v2406_v10 = vmul.f32 %v2402_v8, %v2388_v5 }
 0xc89   : > { %v2405_v12 = vmul.f32 %v2401_v9, %v2383_v7 }
 0xc8a   : > { %v2410_v13 = vmul.f32 0.044715, %v2406_v10  ;;  %v5286_v14 = vpop.f32.mrb[28].mxu1 }
 0xc8b   : > { %v2409_v15 = vmul.f32 0.044715, %v2405_v12  ;;  %v2398_v16 = vadd.f32 %v5286_v14, %v2303_v2  ;;  %v2392_v17 = vpop.f32.mrb[29].mxu1 }
 0xc8c   : > { %v2414_v19 = vadd.f32 %v2410_v13, %v2388_v5  ;;  %v2393_v21 = vadd.f32 %v2392_v17, %v2303_v2  ;;  %v2440_v2 = vrot.slane %v5743_v0, %v2439_v63 }
 0xc8d   : > { %v2413_v22 = vadd.f32 %v2409_v15, %v2383_v7  ;;  %v2404_v25 = vmul.f32 %v2398_v16, %v2398_v16 }
 0xc8e   : > { %v2418_v37 = vmul.f32 0.7978846, %v2414_v19  ;;  %v2403_v51 = vmul.f32 %v2393_v21, %v2393_v21 }
 0xc8f   : > { %v2417_v24 = vmul.f32 0.7978846, %v2413_v22  ;;  %v2408_v40 = vmul.f32 %v2404_v25, %v2398_v16 }
 0xc90   : > { %5669 = vtanh.f32 %v2418_v37  ;;  %v2407_v29 = vmul.f32 %v2403_v51, %v2393_v21 }
 0xc91   : > { %5671 = vtanh.f32 %v2417_v24  ;;  %v2412_v31 = vmul.f32 0.044715, %v2408_v40 }
 0xc92   : > { %v2411_v32 = vmul.f32 0.044715, %v2407_v29 }
 0xc93   : > { %v2416_v33 = vadd.f32 %v2412_v31, %v2398_v16 }
 0xc94   : > { %v2415_v43 = vadd.f32 %v2411_v32, %v2393_v21 }
 0xc95   : > { %v2420_v35 = vmul.f32 0.7978846, %v2416_v33 }
 0xc96   : > { %v2419_v39 = vmul.f32 0.7978846, %v2415_v43 }
 0xc97   : > { %5673 = vtanh.f32 %v2420_v35 }
 0xc98   : > { %5675 = vtanh.f32 %v2419_v39 }
 0xc9a   : > { %v5670_v42 = vpop.eup %5669 }
 0xc9b   : > { %v5672_v48 = vpop.eup %5671  ;;  %v2426_v38 = vadd.f32 1.0, %v5670_v42 }
 0xc9c   : > { %v2425_v36 = vadd.f32 1.0, %v5672_v48 }
 0xc9d   : > { %v2430_v53 = vmul.f32 0.5, %v2426_v38 }
 0xc9e   : > { %v2429_v56 = vmul.f32 0.5, %v2425_v36 }
 0xc9f   : > { %v2434_v55 = vmul.f32 %v2430_v53, %v2388_v5  ;;  %v4895_v53 = vld [vmem:[%s6619_s5 + $0x20] sm:$0xff] }
 0xca0   : > { %v2433_v54 = vmul.f32 %v2429_v56, %v2383_v7  ;;  %v4896_v56 = vld [vmem:[%s6619_s5 + $0x28] sm:$0xff] }
 0xca1   : > { %v5674_v49 = vpop.eup %5673 }
 0xca2   : > { %v5676_v58 = vpop.eup %5675  ;;  %5303 = vmatprep.mubr.msk.f32.mxu0 %vm2441_vm8, %v2433_v54  ;;  %v2428_v59 = vadd.f32 1.0, %v5674_v49  ;;  %v5547_v54 = vpack.c.bf16 %v4896_v56, %v4895_v53  ;;  %v4897_v49 = vld [vmem:[%s6619_s5 + $0x30] sm:$0xff] }
 0xca3   : > { %5304 = vmatmul.mubr.msk.f32.vlgmr.msra.gmra.mrb[18].mxu0 %vm2441_vm8, %v2434_v55  ;;  %v2427_v41 = vadd.f32 1.0, %v5676_v58  ;;  %v4898_v55 = vld [vmem:[%s6619_s5 + $0x38] sm:$0xff] }
 0xca4   : > { %v2432_v60 = vmul.f32 0.5, %v2428_v59  ;;  %5548 = vmatprep.subr.bf16.mxu1 %v5547_v54  ;;  %v5551_v58 = vpack.c.bf16 %v4898_v55, %v4897_v49 }
 0xca5   : > { %v2431_v44 = vmul.f32 0.5, %v2427_v41  ;;  %5550 = vmatpush3.bf16.msra.mxu1 %v5547_v54 }
 0xca6   : > { %v2436_v62 = vmul.f32 %v2432_v60, %v2398_v16  ;;  %5552 = vmatprep.subr.bf16.mxu1 %v5551_v58 }
 0xca7   : > { %v2435_v61 = vmul.f32 %v2431_v44, %v2393_v21 }
 0xca9   : > { %5306 = vmatprep.mubr.msk.f32.mxu0 %vm2441_vm8, %v2435_v61  ;;  %5554 = vmatpush3.bf16.msra.mxu1 %v5551_v58 }
 0xcaa   : > { %5307 = vmatmul.mubr.msk.f32.gmra.mrb[20].mxu0 %vm2441_vm8, %v2436_v62  ;;  %5323 = vmatprep.subr.mxu1 %v5754_v45 }
 0xcab   : > { %5335 = vmatprep.mubr.msk.f32.mxu0 %vm5755_vm5, %v5754_v45 }
 0xd76   : > { %v5305_v4 = vpop.f32.mrb[18].mxu0 }
 0xd77   : > { %v2526_v5 = vadd.f32 %v5305_v4, %v2440_v2  ;;  %v2520_v6 = vpop.f32.mrb[19].mxu0 }
 0xd78   : > { %v2521_v7 = vadd.f32 %v2520_v6, %v2440_v2 }
 0xd79   : > { %v2540_v8 = vadd.f32 %v2526_v5, %v6188_v50 }
 0xd7a   : > { %v2539_v9 = vadd.f32 %v2521_v7, %v6186_v47  ;;  %v6271_v7 = vld [vmem:[%s6618_s4 + $0x8] sm:$0xff] }
 0xd7b   : > { %v2546_v10 = vsel %vm546_vm4, %v2540_v8, 0.0 }
 0xd7c   : > { %2547 = vadd.xlane.f32.xlu0 %v2546_v10  ;;  %v2543_v12 = vsel %vm546_vm4, %v2539_v9, 0.0 }
 0xd7d   : > { %2544 = vadd.xlane.f32.xlu1 %v2543_v12  ;;  %v5308_v13 = vpop.f32.mrb[20].mxu0 }
 0xd7e   : > { %v2536_v14 = vadd.f32 %v5308_v13, %v2440_v2  ;;  %v2530_v15 = vpop.f32.mrb[21].mxu0 }
 0xd7f   : > { %v2531_v16 = vadd.f32 %v2530_v15, %v2440_v2  ;;  %v2606_v15 = vrot.slane %v6271_v7, %v5922_v26 }
 0xd80   : > { %v2542_v17 = vadd.f32 %v2536_v14, %v6198_v57 }
 0xd81   : > { %v2541_v19 = vadd.f32 %v2531_v16, %v6194_v52 }
 0xd82   : > { %v2552_v21 = vsel %vm546_vm4, %v2542_v17, 0.0 }
 0xd83   : > { %2553 = vadd.xlane.f32.xlu0 %v2552_v21  ;;  %v2549_v50 = vsel %vm546_vm4, %v2541_v19, 0.0 }
 0xd84   : > { %2550 = vadd.xlane.f32.xlu1 %v2549_v50 }
 0xe09   : > { %v2548_v47 = vpop.xlane.xlu0 %2547 }
 0xe0a   : > { %v2556_v22 = vmul.f32 0.03125, %v2548_v47  ;;  %v2545_v25 = vpop.xlane.xlu1 %2544 }
 0xe0b   : > { %v2555_v37 = vmul.f32 0.03125, %v2545_v25 }
 0xe0c   : > { %v2560_v51 = vsub.f32 %v2540_v8, %v2556_v22 }
 0xe0d   : > { %v2559_v24 = vsub.f32 %v2539_v9, %v2555_v37  ;;  %v2598_v9 = vrot.slane %v6271_v7, %v5914_v23 }
 0xe0e   : > { %v2564_v40 = vmul.f32 %v2560_v51, %v2560_v51 }
 0xe0f   : > { %v2563_v29 = vmul.f32 %v2559_v24, %v2559_v24 }
 0xe10   : > { %v2554_v31 = vpop.xlane.xlu0 %2553  ;;  %v2570_v32 = vsel %vm546_vm4, %v2564_v40, 0.0 }
 0xe11   : > { %v2558_v57 = vmul.f32 0.03125, %v2554_v31  ;;  %v2551_v33 = vpop.xlane.xlu1 %2550  ;;  %2571 = vadd.xlane.f32.xlu0 %v2570_v32  ;;  %v2567_v52 = vsel %vm546_vm4, %v2563_v29, 0.0  ;;  %v2638_v29 = vrot.slane %v6271_v7, %v5951_v46 }
 0xe12   : > { %v2557_v43 = vmul.f32 0.03125, %v2551_v33  ;;  %2568 = vadd.xlane.f32.xlu1 %v2567_v52 }
 0xe13   : > { %v2562_v35 = vsub.f32 %v2542_v17, %v2558_v57 }
 0xe14   : > { %v2561_v39 = vsub.f32 %v2541_v19, %v2557_v43 }
 0xe15   : > { %v2566_v42 = vmul.f32 %v2562_v35, %v2562_v35 }
 0xe16   : > { %v2565_v48 = vmul.f32 %v2561_v39, %v2561_v39 }
 0xe17   : > { %v2576_v38 = vsel %vm546_vm4, %v2566_v42, 0.0 }
 0xe18   : > { %2577 = vadd.xlane.f32.xlu0 %v2576_v38  ;;  %v2573_v36 = vsel %vm546_vm4, %v2565_v48, 0.0 }
 0xe19   : > { %2574 = vadd.xlane.f32.xlu1 %v2573_v36 }
 0xe9e   : > { %v2572_v59 = vpop.xlane.xlu0 %2571 }
 0xe9f   : > { %v2580_v41 = vmul.f32 0.03125, %v2572_v59  ;;  %v2569_v60 = vpop.xlane.xlu1 %2568 }
 0xea0   : > { %v2579_v44 = vmul.f32 0.03125, %v2569_v60 }
 0xea1   : > { %v2584_v61 = vadd.f32 1e-12, %v2580_v41 }
 0xea2   : > { %v2583_v62 = vadd.f32 1e-12, %v2579_v44 }
 0xea3   : > { %5677 = vrsqrt.f32 %v2584_v61 }
 0xea4   : > { %5679 = vrsqrt.f32 %v2583_v62 }
 0xea5   : > { %v2578_v0 = vpop.xlane.xlu0 %2577 }
 0xea6   : > { %v2582_v2 = vmul.f32 0.03125, %v2578_v0  ;;  %v2575_v4 = vpop.xlane.xlu1 %2574 }
 0xea7   : > { %v2581_v5 = vmul.f32 0.03125, %v2575_v4 }
 0xea8   : > { %v2586_v6 = vadd.f32 1e-12, %v2582_v2 }
 0xea9   : > { %v2585_v8 = vadd.f32 1e-12, %v2581_v5 }
 0xeaa   : > { %5681 = vrsqrt.f32 %v2586_v6 }
 0xeab   : > { %5683 = vrsqrt.f32 %v2585_v8 }
 0xead   : > { %v5678_v10 = vpop.eup %5677 }
 0xeae   : > { %v5680_v12 = vpop.eup %5679  ;;  %v2592_v13 = vmul.f32 %v5678_v10, %v2560_v51 }
 0xeaf   : > { %v2591_v14 = vmul.f32 %v5680_v12, %v2559_v24 }
 0xeb0   : > { %v2600_v16 = vmul.f32 %v2598_v9, %v2592_v13 }
 0xeb1   : > { %v2599_v17 = vmul.f32 %v2598_v9, %v2591_v14 }
 0xeb2   : > { %v6279_v50 = vadd.f32 %v2606_v15, %v2600_v16 }
 0xeb3   : > { %v6277_v19 = vadd.f32 %v2606_v15, %v2599_v17 }
 0xeb4   : > { %v5682_v21 = vpop.eup %5681 }
 0xeb5   : > { %v5684_v47 = vpop.eup %5683  ;;  %5317 = vmatprep.mubr.msk.f32.mxu1 %vm546_vm4, %v6277_v19  ;;  %v2594_v22 = vmul.f32 %v5682_v21, %v2562_v35 }
 0xeb6   : > { %5318 = vmatmul.mubr.msk.f32.vlgmr.msra.gmra.mrb[30].mxu1 %vm546_vm4, %v6279_v50  ;;  %v2593_v25 = vmul.f32 %v5684_v47, %v2561_v39 }
 0xeb7   : > { %v2602_v37 = vmul.f32 %v2598_v9, %v2594_v22 }
 0xeb8   : > { %v2601_v51 = vmul.f32 %v2598_v9, %v2593_v25 }
 0xeb9   : > { %v6287_v40 = vadd.f32 %v2606_v15, %v2602_v37 }
 0xeba   : > { %v6285_v24 = vadd.f32 %v2606_v15, %v2601_v51 }
 0xebc   : > { %5320 = vmatprep.mubr.msk.f32.mxu1 %vm546_vm4, %v6285_v24 }
 0xebd   : > { %5321 = vmatmul.mubr.msk.f32.gmra.mrb[32].mxu1 %vm546_vm4, %v6287_v40 }
 0xebe   : > { %5325 = vmatprep.mubr.msk.f32.mxu1 %vm5755_vm5, %v5754_v45 }
 0xf89   : > { %v5319_v31 = vpop.f32.mrb[30].mxu1 }
 0xf8a   : > { %v6297_v32 = vadd.f32 %v5319_v31, %v2638_v29  ;;  %v2717_v57 = vpop.f32.mrb[31].mxu1 }
 0xf8b   : > { %v6299_v33 = vadd.f32 %v2717_v57, %v2638_v29 }
 0xf8c   : > { %2814 = vrot.lane.b32.xlu0 %v6297_v32, %s5756_s15 }
 0xf8d   : > { %2737 = vrot.lane.b32.xlu1 %v6299_v33, %s5756_s15 }
 0xf90   : > { %3172 = vrot.lane.b32.xlu0 %v6297_v32, %s5757_s16  ;;  %v5322_v52 = vpop.f32.mrb[32].mxu1 }
 0xf91   : > { %v2727_v43 = vpop.f32.mrb[33].mxu1  ;;  %v6311_v39 = vadd.f32 %v5322_v52, %v2638_v29 }
 0xf92   : > { %v6307_v35 = vadd.f32 %v2727_v43, %v2638_v29 }
 0xf94   : > { %2891 = vrot.lane.b32.xlu1 %v6307_v35, %s5756_s15 }
 0xf98   : > { %2968 = vrot.lane.b32.xlu1 %v6311_v39, %s5756_s15 }
 0xf9c   : > { %3096 = vrot.lane.b32.xlu1 %v6299_v33, %s5757_s16 }
 0xfa0   : > { %3324 = vrot.lane.b32.xlu1 %v6311_v39, %s5757_s16 }
 0xfa4   : > { %3248 = vrot.lane.b32.xlu1 %v6307_v35, %s5757_s16  ;;  %s405_s16 = scalar_lea.vmem %s6625_s11, %s6627_s19 }
 0xffe   : > { %v2815_v48 = vpop.permute.xlu0 %2814 }
 0xfff   : > { %v2738_v42 = vpop.permute.xlu1 %2737 }
0x1000   : > { %5324 = vmatpush3.xpose.msk.msra.mxu1 %vm752_vm6, %v2738_v42 }
0x1001   : > { %5328 = vmatprep.subr.mxu1 %v5754_v45 }
0x1002   : > { %v3173_v53 = vpop.permute.xlu0 %3172 }
0x1003   : > { %5326 = vmatmul.mubr.msk.f32.vlgmr.msra.gmra.mrb[34].mxu1 %vm752_vm6, %v6299_v33 }
0x1004   : > { %5329 = vmatpush3.xpose.msk.msra.mxu1 %vm752_vm6, %v2815_v48  ;;  %5330 = vmatprep.mubr.msk.f32.mxu1 %vm5755_vm5, %v5754_v45 }
0x1005   : > { %5338 = vmatprep.subr.mxu1 %v5754_v45 }
0x1006   : > { %v2892_v38 = vpop.permute.xlu1 %2891 }
0x1007   : > { %5331 = vmatmul.mubr.msk.f32.vlgmr.msra.gmra.mrb[36].mxu1 %vm752_vm6, %v6297_v32  ;;  %5334 = vmatpush3.xpose.msk.msra.mxu0 %vm752_vm6, %v2892_v38 }
0x1008   : > { %5340 = vmatprep.mubr.msk.f32.mxu1 %vm5755_vm5, %v5754_v45  ;;  %5343 = vmatprep.subr.mxu0 %v5754_v45 }
0x100a   : > { %5336 = vmatmul.mubr.msk.f32.vlgmr.msra.gmra.mrb[22].mxu0 %vm752_vm6, %v6307_v35  ;;  %v2969_v36 = vpop.permute.xlu1 %2968 }
0x100b   : > { %5339 = vmatpush3.xpose.msk.msra.mxu1 %vm752_vm6, %v2969_v36  ;;  %5345 = vmatprep.mubr.msk.f32.mxu0 %vm5755_vm5, %v5754_v45 }
0x100c   : > { %5348 = vmatprep.subr.mxu1 %v5754_v45 }
0x100e   : > { %v3097_v56 = vpop.permute.xlu1 %3096  ;;  %5341 = vmatmul.mubr.msk.f32.vlgmr.msra.gmra.mrb[38].mxu1 %vm752_vm6, %v6311_v39 }
0x100f   : > { %5344 = vmatpush3.msra.mxu0 %v3097_v56  ;;  %5349 = vmatpush3.msra.mxu1 %v3173_v53 }
0x1010   : > { %5353 = vmatprep.subr.mxu0 %v5754_v45  ;;  %5350 = vmatprep.mubr.msk.f32.mxu1 %vm5755_vm5, %v5754_v45 }
0x1011   : > { %5358 = vmatprep.subr.mxu1 %v5754_v45 }
0x1012   : > { %v3325_v14 = vpop.permute.xlu1 %3324 }
0x1016   : > { %v3249_v15 = vpop.permute.xlu1 %3248 }
0x10d6   : > { %v2809_v54 = vpop.f32.mrb[34].mxu1 }
0x10d7   : > { %v3044_v49 = vmul.f32 0.25, %v2809_v54  ;;  %v5327_v55 = vpop.f32.mrb[35].mxu1 }
0x10d9   : > { %v3048_v58 = vadd.f32 %v3044_v49, %v6003_v3 }
0x10da   : > { %v2886_v59 = vpop.f32.mrb[36].mxu1 }
0x10db   : > { %v3045_v41 = vmul.f32 0.25, %v2886_v59  ;;  %v5332_v60 = vpop.f32.mrb[37].mxu1  ;;  %v3052_v44 = vsel %vm1090_vm7, %v3048_v58, -inf }
0x10dc   : > { %3053 = vmax.xlane.f32.xlu0 %v3052_v44 }
0x10dd   : > { %v2963_v61 = vpop.f32.mrb[22].mxu0  ;;  %v3049_v62 = vadd.f32 %v3045_v41, %v6007_v11 }
0x10de   : > { %v3046_v0 = vmul.f32 0.25, %v2963_v61  ;;  %v5337_v2 = vpop.f32.mrb[23].mxu0 }
0x10df   : > { %v3055_v4 = vsel %vm1090_vm7, %v3049_v62, -inf }
0x10e0   : > { %3056 = vmax.xlane.f32.xlu1 %v3055_v4  ;;  %v3050_v5 = vadd.f32 %v3046_v0, %v6012_v20 }
0x10e1   : > { %v3040_v6 = vpop.f32.mrb[38].mxu1 }
0x10e2   : > { %v3047_v8 = vmul.f32 0.25, %v3040_v6  ;;  %v5342_v9 = vpop.f32.mrb[39].mxu1  ;;  %v3058_v10 = vsel %vm1090_vm7, %v3050_v5, -inf }
0x10e3   : > { %3059 = vmax.xlane.f32.xlu0 %v3058_v10 }
0x10e4   : > { %v3051_v12 = vadd.f32 %v3047_v8, %v6017_v30 }
0x10e6   : > { %v3061_v13 = vsel %vm1090_vm7, %v3051_v12, -inf }
0x10e7   : > { %3062 = vmax.xlane.f32.xlu0 %v3061_v13 }
0x10f1   : > { %3480 = vrot.lane.b32.xlu1 %v6297_v32, %s5758_s22 }
0x10fd   : > { %3402 = vrot.lane.b32.xlu0 %v6299_v33, %s5758_s22 }
0x1169   : > { %v3054_v16 = vpop.xlane.xlu0 %3053 }
0x116a   : > { %v3064_v17 = vsub.f32 %v3048_v58, %v3054_v16 }
0x116c   : > { %v3068_v21 = vmul.f32 1.442695, %v3064_v17 }
0x116d   : > { %v3057_v47 = vpop.xlane.xlu1 %3056 }
0x116e   : > { %5685 = vpow2.f32 %v3068_v21  ;;  %v3065_v22 = vsub.f32 %v3049_v62, %v3057_v47 }
0x1170   : > { %v3070_v25 = vmul.f32 1.442695, %v3065_v22  ;;  %v3060_v57 = vpop.xlane.xlu0 %3059 }
0x1171   : > { %v3066_v52 = vsub.f32 %v3050_v5, %v3060_v57  ;;  %v3481_v49 = vpop.permute.xlu1 %3480 }
0x1172   : > { %5687 = vpow2.f32 %v3070_v25 }
0x1173   : > { %v3072_v42 = vmul.f32 1.442695, %v3066_v52 }
0x1174   : > { %v3063_v43 = vpop.xlane.xlu0 %3062 }
0x1175   : > { %v3067_v48 = vsub.f32 %v3051_v12, %v3063_v43  ;;  %5689 = vpow2.f32 %v3072_v42 }
0x1177   : > { %v3074_v38 = vmul.f32 1.442695, %v3067_v48 }
0x1178   : > { %v5686_v37 = vpop.eup %5685  ;;  %v3403_v55 = vpop.permute.xlu0 %3402 }
0x1179   : > { %v3076_v51 = vsel %vm1090_vm7, %v5686_v37, 0.0  ;;  %5691 = vpow2.f32 %v3074_v38 }
0x117a   : > { %3077 = vadd.xlane.f32.xlu1 %v3076_v51 }
0x117c   : > { %v5688_v29 = vpop.eup %5687 }
0x117d   : > { %v3079_v31 = vsel %vm1090_vm7, %v5688_v29, 0.0 }
0x117e   : > { %3080 = vadd.xlane.f32.xlu0 %v3079_v31 }
0x117f   : > { %v5690_v36 = vpop.eup %5689 }
0x1180   : > { %v3082_v53 = vsel %vm1090_vm7, %v5690_v36, 0.0 }
0x1183   : > { %v5692_v56 = vpop.eup %5691 }
0x1184   : > { %v3085_v54 = vsel %vm1090_vm7, %v5692_v56, 0.0 }
0x118b   : > { %3478 = vrot.lane.b32.xlu1 %v6297_v32, %s5759_s23 }
0x1194   : > { %3400 = vrot.lane.b32.xlu0 %v6299_v33, %s5759_s23 }
0x11af   : > { %3083 = vadd.xlane.f32.xlu1 %v3082_v53 }
0x11b3   : > { %3086 = vadd.xlane.f32.xlu0 %v3085_v54 }
0x11c0   : > { %3636 = vrot.lane.b32.xlu1 %v6311_v39, %s5758_s22 }
0x11c4   : > { %3634 = vrot.lane.b32.xlu1 %v6311_v39, %s5759_s23 }
0x11c9   : > { %3558 = vrot.lane.b32.xlu0 %v6307_v35, %s5758_s22 }
0x11cd   : > { %3556 = vrot.lane.b32.xlu0 %v6307_v35, %s5759_s23 }
0x1207   : > { %v3078_v58 = vpop.xlane.xlu1 %3077 }
0x1208   : > { %5693 = vrcp.f32 %v3078_v58 }
0x120b   : > { %v3081_v59 = vpop.xlane.xlu0 %3080  ;;  %v3479_v62 = vpop.permute.xlu1 %3478 }
0x120c   : > { %5695 = vrcp.f32 %v3081_v59 }
0x120f   : > { %v3401_v0 = vpop.permute.xlu0 %3400 }
0x1212   : > { %v5694_v41 = vpop.eup %5693 }
0x1213   : > { %v3092_v60 = vmul.f32 %v5694_v41, %v5686_v37 }
0x1215   : > { %5346 = vmatmul.mubr.msk.f32.vlgmr.msra.gmra.mrb[24].mxu0 %vm1090_vm7, %v3092_v60 }
0x1216   : > { %v5696_v44 = vpop.eup %5695  ;;  %5354 = vmatpush3.msra.mxu0 %v3249_v15  ;;  %5355 = vmatprep.mubr.msk.f32.mxu0 %vm5755_vm5, %v5754_v45 }
0x1217   : > { %v3093_v61 = vmul.f32 %v5696_v44, %v5688_v29  ;;  %5363 = vmatprep.subr.mxu0 %v5754_v45 }
0x1219   : > { %5351 = vmatmul.mubr.msk.f32.vlgmr.msra.gmra.mrb[40].mxu1 %vm1090_vm7, %v3093_v61 }
0x121a   : > { %5359 = vmatpush3.msra.mxu1 %v3325_v14  ;;  %5360 = vmatprep.mubr.msk.f32.mxu1 %vm5755_vm5, %v5754_v45 }
0x121b   : > { %5368 = vmatprep.subr.mxu1 %v5754_v45 }
0x123c   : > { %v3084_v2 = vpop.xlane.xlu1 %3083 }
0x123d   : > { %5697 = vrcp.f32 %v3084_v2 }
0x1240   : > { %v3087_v4 = vpop.xlane.xlu0 %3086  ;;  %v3637_v12 = vpop.permute.xlu1 %3636 }
0x1241   : > { %5699 = vrcp.f32 %v3087_v4 }
0x1244   : > { %v3559_v9 = vpop.permute.xlu0 %3558  ;;  %v3635_v14 = vpop.permute.xlu1 %3634 }
0x1247   : > { %v5698_v5 = vpop.eup %5697 }
0x1248   : > { %v3094_v6 = vmul.f32 %v5698_v5, %v5690_v36  ;;  %v3557_v13 = vpop.permute.xlu0 %3556 }
0x124a   : > { %5356 = vmatmul.mubr.msk.f32.vlgmr.msra.gmra.mrb[26].mxu0 %vm1090_vm7, %v3094_v6 }
0x124b   : > { %v5700_v8 = vpop.eup %5699  ;;  %5364 = vmatpush3.xpose.msk.msra.mxu0 %vm752_vm6, %v3403_v55  ;;  %5365 = vmatprep.mubr.msk.f32.mxu0 %vm5755_vm5, %v5754_v45 }
0x124c   : > { %v3095_v10 = vmul.f32 %v5700_v8, %v5692_v56  ;;  %5373 = vmatprep.subr.mxu0 %v5754_v45 }
0x124e   : > { %5361 = vmatmul.mubr.msk.f32.vlgmr.msra.gmra.mrb[42].mxu1 %vm1090_vm7, %v3095_v10  ;;  %5366 = vmatmul.mubr.msk.f32.vlgmr.msra.gmra.mrb[28].mxu0 %vm752_vm6, %v3401_v0 }
0x124f   : > { %5369 = vmatpush3.xpose.msk.msra.mxu1 %vm752_vm6, %v3481_v49  ;;  %5374 = vmatpush3.xpose.msk.msra.mxu0 %vm752_vm6, %v3559_v9 }
0x1250   : > { %5370 = vmatprep.mubr.msk.f32.mxu1 %vm5755_vm5, %v5754_v45  ;;  %5375 = vmatprep.mubr.msk.f32.mxu0 %vm5755_vm5, %v5754_v45 }
0x1251   : > { %5378 = vmatprep.subr.mxu1 %v5754_v45  ;;  %5383 = vmatprep.subr.mxu0 %v5754_v45 }
0x1252   : > { %5371 = vmatmul.mubr.msk.f32.vlgmr.msra.gmra.mrb[44].mxu1 %vm752_vm6, %v3479_v62  ;;  %5376 = vmatmul.mubr.msk.f32.vlgmr.msra.gmra.mrb[30].mxu0 %vm752_vm6, %v3557_v13 }
0x1253   : > { %5379 = vmatpush3.xpose.msk.msra.mxu1 %vm752_vm6, %v3637_v12  ;;  %5380 = vmatprep.mubr.msk.f32.mxu1 %vm5755_vm5, %v5754_v45 }
0x1254   : > { %5388 = vmatprep.subr.mxu1 %v5754_v45  ;;  %5385 = vmatprep.mubr.msk.f32.mxu0 %vm5755_vm5, %v5754_v45 }
0x1256   : > { %5381 = vmatmul.mubr.msk.f32.vlgmr.msra.gmra.mrb[46].mxu1 %vm752_vm6, %v3635_v14 }
0x1257   : > { %5390 = vmatprep.mubr.msk.f32.mxu1 %vm5755_vm5, %v5754_v45 }
0x12e8   : > { %v6409_v15 = vpop.f32.mrb[24].mxu0 }
0x12e9   : > { %v5347_v16 = vpop.f32.mrb[25].mxu0 }
0x12ec   : > { %v6411_v17 = vpop.f32.mrb[40].mxu1 }
0x12ed   : > { %v5352_v21 = vpop.f32.mrb[41].mxu1 }
0x131d   : > { %v6413_v47 = vpop.f32.mrb[26].mxu0 }
0x131e   : > { %v5357_v22 = vpop.f32.mrb[27].mxu0 }
0x1321   : > { %v6415_v25 = vpop.f32.mrb[42].mxu1  ;;  %v3474_v37 = vpop.f32.mrb[28].mxu0 }
0x1322   : > { %v3712_v51 = vmul.f32 0.25, %v3474_v37  ;;  %v5362_v29 = vpop.f32.mrb[43].mxu1  ;;  %v5367_v31 = vpop.f32.mrb[29].mxu0 }
0x1324   : > { %v3716_v57 = vadd.f32 %v3712_v51, %v6003_v3 }
0x1325   : > { %v3552_v52 = vpop.f32.mrb[44].mxu1  ;;  %v3630_v43 = vpop.f32.mrb[30].mxu0 }
0x1326   : > { %v3713_v42 = vmul.f32 0.25, %v3552_v52  ;;  %v3714_v48 = vmul.f32 0.25, %v3630_v43  ;;  %v5372_v38 = vpop.f32.mrb[45].mxu1  ;;  %v5377_v36 = vpop.f32.mrb[31].mxu0  ;;  %v3720_v53 = vsel %vm1090_vm7, %v3716_v57, -inf }
0x1327   : > { %3721 = vmax.xlane.f32.xlu0 %v3720_v53 }
0x1328   : > { %v3717_v56 = vadd.f32 %v3713_v42, %v6007_v11  ;;  %v3718_v54 = vadd.f32 %v3714_v48, %v6012_v20 }
0x1329   : > { %v3708_v49 = vpop.f32.mrb[46].mxu1 }
0x132a   : > { %v3715_v55 = vmul.f32 0.25, %v3708_v49  ;;  %v5382_v58 = vpop.f32.mrb[47].mxu1  ;;  %v3723_v59 = vsel %vm1090_vm7, %v3717_v56, -inf  ;;  %v3726_v3 = vsel %vm1090_vm7, %v3718_v54, -inf }
0x132b   : > { %3724 = vmax.xlane.f32.xlu1 %v3723_v59  ;;  %3727 = vmax.xlane.f32.xlu0 %v3726_v3  ;;  %v4902_v58 = vld [vmem:[%s6620_s6 + $0x38] sm:$0xff] }
0x132c   : > { %v3719_v41 = vadd.f32 %v3715_v55, %v6017_v30  ;;  %v4901_v55 = vld [vmem:[%s6620_s6 + $0x30] sm:$0xff] }
0x132d   : > { %v5559_v59 = vpack.c.bf16 %v4902_v58, %v4901_v55 }
0x132e   : > { %v3729_v60 = vsel %vm1090_vm7, %v3719_v41, -inf }
0x132f   : > { %3730 = vmax.xlane.f32.xlu0 %v3729_v60 }
0x133c   : > { %3764 = vrot.lane.b32.xlu1 %v6299_v33, %s5760_s24 }
0x13b4   : > { %v3722_v11 = vpop.xlane.xlu0 %3721 }
0x13b5   : > { %v3732_v44 = vsub.f32 %v3716_v57, %v3722_v11 }
0x13b7   : > { %v3736_v20 = vmul.f32 1.442695, %v3732_v44 }
0x13b8   : > { %v3725_v61 = vpop.xlane.xlu1 %3724  ;;  %v3728_v62 = vpop.xlane.xlu0 %3727 }
0x13b9   : > { %5701 = vpow2.f32 %v3736_v20  ;;  %v3733_v0 = vsub.f32 %v3717_v56, %v3725_v61  ;;  %v3734_v2 = vsub.f32 %v3718_v54, %v3728_v62  ;;  %v4899_v56 = vld [vmem:[%s6620_s6 + $0x20] sm:$0xff]  ;;  %v4900_v54 = vld [vmem:[%s6620_s6 + $0x28] sm:$0xff] }
0x13ba   : > { %v5555_v49 = vpack.c.bf16 %v4900_v54, %v4899_v56 }
0x13bb   : > { %v3738_v4 = vmul.f32 1.442695, %v3733_v0  ;;  %v3740_v5 = vmul.f32 1.442695, %v3734_v2 }
0x13bc   : > { %v3765_v6 = vpop.permute.xlu1 %3764  ;;  %v3731_v8 = vpop.xlane.xlu0 %3730 }
0x13bd   : > { %5703 = vpow2.f32 %v3738_v4  ;;  %v3735_v30 = vsub.f32 %v3719_v41, %v3731_v8  ;;  %5384 = vmatpush3.msra.mxu0 %v3765_v6 }
0x13be   : > { %5705 = vpow2.f32 %v3740_v5  ;;  %5393 = vmatprep.subr.mxu0 %v5754_v45 }
0x13bf   : > { %v3742_v9 = vmul.f32 1.442695, %v3735_v30 }
0x13c1   : > { %5707 = vpow2.f32 %v3742_v9 }
0x13c3   : > { %v5702_v33 = vpop.eup %5701 }
0x13c4   : > { %v3744_v10 = vsel %vm1090_vm7, %v5702_v33, 0.0 }
0x13c5   : > { %3745 = vadd.xlane.f32.xlu1 %v3744_v10 }
0x13c7   : > { %v5704_v12 = vpop.eup %5703 }
0x13c8   : > { %v5706_v13 = vpop.eup %5705  ;;  %v3747_v14 = vsel %vm1090_vm7, %v5704_v12, 0.0 }
0x13c9   : > { %3748 = vadd.xlane.f32.xlu0 %v3747_v14  ;;  %v3750_v16 = vsel %vm1090_vm7, %v5706_v13, 0.0 }
0x13ca   : > { %3751 = vadd.xlane.f32.xlu1 %v3750_v16 }
0x13cb   : > { %v5708_v21 = vpop.eup %5707 }
0x13cc   : > { %v3753_v22 = vsel %vm1090_vm7, %v5708_v21, 0.0 }
0x13cd   : > { %3754 = vadd.xlane.f32.xlu0 %v3753_v22 }
0x13db   : > { %3916 = vrot.lane.b32.xlu1 %v6307_v35, %s5760_s24 }
0x13df   : > { %3992 = vrot.lane.b32.xlu1 %v6311_v39, %s5760_s24 }
0x13e3   : > { %3840 = vrot.lane.b32.xlu0 %v6297_v32, %s5760_s24 }
0x1452   : > { %v3746_v37 = vpop.xlane.xlu1 %3745 }
0x1453   : > { %5709 = vrcp.f32 %v3746_v37 }
0x1456   : > { %v3749_v51 = vpop.xlane.xlu0 %3748 }
0x1457   : > { %v3752_v29 = vpop.xlane.xlu1 %3751  ;;  %5711 = vrcp.f32 %v3749_v51 }
0x1458   : > { %5713 = vrcp.f32 %v3752_v29 }
0x145a   : > { %v3755_v31 = vpop.xlane.xlu0 %3754 }
0x145b   : > { %5715 = vrcp.f32 %v3755_v31  ;;  %v3917_v43 = vpop.permute.xlu1 %3916 }
0x145d   : > { %v5710_v57 = vpop.eup %5709 }
0x145e   : > { %v3760_v52 = vmul.f32 %v5710_v57, %v5702_v33  ;;  %v3841_v42 = vpop.permute.xlu0 %3840 }
0x145f   : > { %5389 = vmatpush3.msra.mxu1 %v3841_v42  ;;  %v3993_v38 = vpop.permute.xlu1 %3992 }
0x1460   : > { %5386 = vmatmul.mubr.msk.f32.vlgmr.msra.gmra.mrb[32].mxu0 %vm1090_vm7, %v3760_v52  ;;  %5398 = vmatprep.subr.mxu1 %v5754_v45 }
0x1461   : > { %v5712_v35 = vpop.eup %5711  ;;  %5394 = vmatpush3.msra.mxu0 %v3917_v43  ;;  %5395 = vmatprep.mubr.msk.f32.mxu0 %vm5755_vm5, %v5754_v45 }
0x1462   : > { %v5714_v32 = vpop.eup %5713  ;;  %v3761_v39 = vmul.f32 %v5712_v35, %v5704_v12  ;;  %5556 = vmatprep.subr.bf16.mxu0 %v5555_v49 }
0x1463   : > { %v3762_v48 = vmul.f32 %v5714_v32, %v5706_v13 }
0x1464   : > { %5391 = vmatmul.mubr.msk.f32.vlgmr.msra.gmra.mrb[48].mxu1 %vm1090_vm7, %v3761_v39 }
0x1465   : > { %v5716_v36 = vpop.eup %5715  ;;  %5396 = vmatmul.mubr.msk.f32.vlgmr.msra.gmra.mrb[34].mxu0 %vm1090_vm7, %v3762_v48  ;;  %5399 = vmatpush3.msra.mxu1 %v3993_v38 }
0x1466   : > { %v3763_v53 = vmul.f32 %v5716_v36, %v5708_v21  ;;  %5400 = vmatprep.mubr.msk.f32.mxu1 %vm5755_vm5, %v5754_v45  ;;  %5558 = vmatpush3.bf16.msra.mxu0 %v5555_v49 }
0x1467   : > { %5560 = vmatprep.subr.bf16.mxu0 %v5559_v59 }
0x1468   : > { %5401 = vmatmul.mubr.msk.f32.vlgmr.msra.gmra.mrb[50].mxu1 %vm1090_vm7, %v3763_v53 }
0x146a   : > { %5562 = vmatpush3.bf16.msra.mxu0 %v5559_v59 }
0x1533   : > { %v3836_v3 = vpop.f32.mrb[32].mxu0 }
0x1534   : > { %v5387_v41 = vpop.f32.mrb[33].mxu0  ;;  %4072 = vrot.lane.b32.xlu0 %v3836_v3, %s5761_s14  ;;  %v4903_v3 = vld [vmem:[%s6621_s7 + $0x20] sm:$0xff] }
0x1535   : > { %v4904_v41 = vld [vmem:[%s6621_s7 + $0x28] sm:$0xff] }
0x1537   : > { %v3912_v60 = vpop.f32.mrb[48].mxu1 }
0x1538   : > { %v3988_v11 = vpop.f32.mrb[34].mxu0  ;;  %4074 = vrot.lane.b32.xlu1 %v3912_v60, %s5761_s14  ;;  %v5392_v44 = vpop.f32.mrb[49].mxu1  ;;  %v5563_v60 = vpack.c.bf16 %v4904_v41, %v4903_v3 }
0x1539   : > { %v5397_v20 = vpop.f32.mrb[35].mxu0  ;;  %4076 = vrot.lane.b32.xlu0 %v3988_v11, %s5761_s14  ;;  %v4905_v11 = vld [vmem:[%s6621_s7 + $0x30] sm:$0xff]  ;;  %v4906_v44 = vld [vmem:[%s6621_s7 + $0x38] sm:$0xff] }
0x153a   : > { %5564 = vmatprep.subr.bf16.mxu1 %v5563_v60  ;;  %v5567_v20 = vpack.c.bf16 %v4906_v44, %v4905_v11 }
0x153b   : > { %v4064_v61 = vpop.f32.mrb[50].mxu1  ;;  %5566 = vmatpush3.bf16.msra.mxu1 %v5563_v60 }
0x153c   : > { %4078 = vrot.lane.b32.xlu1 %v4064_v61, %s5761_s14  ;;  %v5402_v62 = vpop.f32.mrb[51].mxu1  ;;  %5568 = vmatprep.subr.bf16.mxu1 %v5567_v20 }
0x153f   : > { %5570 = vmatpush3.bf16.msra.mxu1 %v5567_v20 }
0x15a6   : > { %v4073_v0 = vpop.permute.xlu0 %4072 }
0x15a7   : > { %v4084_v2 = vsel %vm752_vm6, %v6409_v15, %v4073_v0  ;;  %v4091_v15 = vrot.slane %v6271_v7, %v6150_v34 }
0x15a8   : > { %5411 = vmatprep.mubr.msk.f32.mxu0 %vm546_vm4, %v4084_v2 }
0x15aa   : > { %v4075_v4 = vpop.permute.xlu1 %4074 }
0x15ab   : > { %v4085_v5 = vsel %vm752_vm6, %v6411_v17, %v4075_v4  ;;  %v4077_v6 = vpop.permute.xlu0 %4076 }
0x15ac   : > { %v4086_v8 = vsel %vm752_vm6, %v6413_v47, %v4077_v6  ;;  %5412 = vmatmul.mubr.msk.f32.vlgmr.msra.gmra.mrb[36].mxu0 %vm546_vm4, %v4085_v5 }
0x15ad   : > { %5414 = vmatprep.mubr.msk.f32.mxu0 %vm546_vm4, %v4086_v8 }
0x15ae   : > { %v4079_v30 = vpop.permute.xlu1 %4078 }
0x15af   : > { %v4087_v9 = vsel %vm752_vm6, %v6415_v25, %v4079_v30 }
0x15b0   : > { %5415 = vmatmul.mubr.msk.f32.gmra.mrb[38].mxu0 %vm546_vm4, %v4087_v9 }
0x167f   : > { %v5413_v33 = vpop.f32.mrb[36].mxu0 }
0x1680   : > { %v4176_v10 = vadd.f32 %v5413_v33, %v4091_v15  ;;  %v4170_v17 = vpop.f32.mrb[37].mxu0 }
0x1681   : > { %v4171_v12 = vadd.f32 %v4170_v17, %v4091_v15 }
0x1682   : > { %v4190_v13 = vadd.f32 %v4176_v10, %v6279_v50  ;;  %v4248_v10 = vrot.slane %v6271_v7, %v2286_v27 }
0x1683   : > { %v4189_v47 = vadd.f32 %v4171_v12, %v6277_v19  ;;  %v5416_v14 = vpop.f32.mrb[38].mxu0 }
0x1684   : > { %v4180_v16 = vpop.f32.mrb[39].mxu0  ;;  %v4196_v21 = vsel %vm546_vm4, %v4190_v13, 0.0  ;;  %v4186_v22 = vadd.f32 %v5416_v14, %v4091_v15  ;;  %v4256_v14 = vrot.slane %v6271_v7, %v2294_v28 }
0x1685   : > { %v4181_v37 = vadd.f32 %v4180_v16, %v4091_v15  ;;  %4197 = vadd.xlane.f32.xlu1 %v4196_v21  ;;  %v4193_v25 = vsel %vm546_vm4, %v4189_v47, 0.0 }
0x1686   : > { %4194 = vadd.xlane.f32.xlu0 %v4193_v25  ;;  %v4192_v29 = vadd.f32 %v4186_v22, %v6287_v40 }
0x1687   : > { %v4191_v51 = vadd.f32 %v4181_v37, %v6285_v24 }
0x1688   : > { %v4202_v50 = vsel %vm546_vm4, %v4192_v29, 0.0 }
0x1689   : > { %v4199_v31 = vsel %vm546_vm4, %v4191_v51, 0.0 }
0x168a   : > { %4200 = vadd.xlane.f32.xlu0 %v4199_v31 }
0x168e   : > { %4203 = vadd.xlane.f32.xlu0 %v4202_v50 }
0x1712   : > { %v4198_v19 = vpop.xlane.xlu1 %4197 }
0x1713   : > { %v4206_v57 = vmul.f32 0.03125, %v4198_v19  ;;  %v4195_v52 = vpop.xlane.xlu0 %4194 }
0x1714   : > { %v4205_v43 = vmul.f32 0.03125, %v4195_v52  ;;  %v4908_v52 = vld [vmem:[%s6622_s8 + $0x48] sm:$0xff] }
0x1715   : > { %v4210_v42 = vsub.f32 %v4190_v13, %v4206_v57  ;;  %v4907_v57 = vld [vmem:[%s6622_s8 + $0x40] sm:$0xff] }
0x1716   : > { %v4209_v35 = vsub.f32 %v4189_v47, %v4205_v43  ;;  %v5571_v43 = vpack.c.bf16 %v4908_v52, %v4907_v57 }
0x1717   : > { %v4201_v32 = vpop.xlane.xlu0 %4200  ;;  %v4214_v39 = vmul.f32 %v4210_v42, %v4210_v42 }
0x1718   : > { %v4207_v48 = vmul.f32 0.03125, %v4201_v32  ;;  %v4213_v38 = vmul.f32 %v4209_v35, %v4209_v35  ;;  %5572 = vmatprep.subr.bf16.mxu0 %v5571_v43 }
0x1719   : > { %v4220_v24 = vsel %vm546_vm4, %v4214_v39, 0.0  ;;  %5574 = vmatpush3.bf16.msra.mxu0 %v5571_v43  ;;  %v4911_v39 = vld [vmem:[%s6622_s8 + $0x60] sm:$0xff] }
0x171a   : > { %v4211_v36 = vsub.f32 %v4191_v51, %v4207_v48  ;;  %4221 = vadd.xlane.f32.xlu0 %v4220_v24  ;;  %v4217_v40 = vsel %vm546_vm4, %v4213_v38, 0.0  ;;  %v4912_v48 = vld [vmem:[%s6622_s8 + $0x68] sm:$0xff]  ;;  %v4913_v24 = vld [vmem:[%s6622_s8 + $0x70] sm:$0xff] }
0x171b   : > { %4218 = vadd.xlane.f32.xlu1 %v4217_v40  ;;  %v4204_v53 = vpop.xlane.xlu0 %4203  ;;  %v5579_v38 = vpack.c.bf16 %v4912_v48, %v4911_v39 }
0x171c   : > { %v4208_v56 = vmul.f32 0.03125, %v4204_v53  ;;  %v4215_v54 = vmul.f32 %v4211_v36, %v4211_v36  ;;  %v4264_v53 = vrot.slane %v6271_v7, %v2302_v1 }
0x171e   : > { %v4212_v49 = vsub.f32 %v4192_v29, %v4208_v56  ;;  %v4223_v55 = vsel %vm546_vm4, %v4215_v54, 0.0 }
0x171f   : > { %4224 = vadd.xlane.f32.xlu1 %v4223_v55 }
0x1720   : > { %v4216_v58 = vmul.f32 %v4212_v49, %v4212_v49 }
0x1722   : > { %v4226_v59 = vsel %vm546_vm4, %v4216_v58, 0.0 }
0x1723   : > { %4227 = vadd.xlane.f32.xlu0 %v4226_v59 }
0x17a7   : > { %v4222_v61 = vpop.xlane.xlu0 %4221 }
0x17a8   : > { %v4230_v62 = vmul.f32 0.03125, %v4222_v61  ;;  %v4219_v0 = vpop.xlane.xlu1 %4218 }
0x17a9   : > { %v4229_v2 = vmul.f32 0.03125, %v4219_v0 }
0x17aa   : > { %v4234_v4 = vadd.f32 1e-12, %v4230_v62 }
0x17ab   : > { %v4233_v5 = vadd.f32 1e-12, %v4229_v2 }
0x17ac   : > { %5717 = vrsqrt.f32 %v4234_v4  ;;  %v4225_v6 = vpop.xlane.xlu1 %4224 }
0x17ad   : > { %5719 = vrsqrt.f32 %v4233_v5  ;;  %v4231_v8 = vmul.f32 0.03125, %v4225_v6 }
0x17af   : > { %v4235_v30 = vadd.f32 1e-12, %v4231_v8 }
0x17b0   : > { %v4228_v9 = vpop.xlane.xlu0 %4227 }
0x17b1   : > { %5721 = vrsqrt.f32 %v4235_v30  ;;  %v4232_v15 = vmul.f32 0.03125, %v4228_v9 }
0x17b3   : > { %v4236_v33 = vadd.f32 1e-12, %v4232_v15 }
0x17b5   : > { %5723 = vrsqrt.f32 %v4236_v33 }
0x17b6   : > { %v5718_v17 = vpop.eup %5717 }
0x17b7   : > { %v5720_v12 = vpop.eup %5719  ;;  %v4242_v13 = vmul.f32 %v5718_v17, %v4210_v42  ;;  %v4909_v42 = vld [vmem:[%s6622_s8 + $0x50] sm:$0xff] }
0x17b8   : > { %v4241_v47 = vmul.f32 %v5720_v12, %v4209_v35  ;;  %v4910_v35 = vld [vmem:[%s6622_s8 + $0x58] sm:$0xff] }
0x17b9   : > { %v4250_v16 = vmul.f32 %v4248_v10, %v4242_v13  ;;  %v5575_v32 = vpack.c.bf16 %v4910_v35, %v4909_v42 }
0x17ba   : > { %v4249_v21 = vmul.f32 %v4248_v10, %v4241_v47 }
0x17bb   : > { %v5722_v22 = vpop.eup %5721  ;;  %v6509_v51 = vadd.f32 %v4256_v14, %v4250_v16  ;;  %5576 = vmatprep.subr.bf16.mxu0 %v5575_v32 }
0x17bc   : > { %v6507_v37 = vadd.f32 %v4256_v14, %v4249_v21  ;;  %v4243_v25 = vmul.f32 %v5722_v22, %v4211_v36  ;;  %5578 = vmatpush3.bf16.msra.mxu0 %v5575_v32  ;;  %v4914_v36 = vld [vmem:[%s6622_s8 + $0x78] sm:$0xff]  ;;  %v4401_v32 = vrot.slane %v6271_v7, %v2439_v63 }
0x17bd   : > { %5580 = vmatprep.subr.bf16.mxu0 %v5579_v38  ;;  %v5583_v40 = vpack.c.bf16 %v4914_v36, %v4913_v24 }
0x17be   : > { %5425 = vmatprep.mubr.msk.f32.mxu1 %vm546_vm4, %v6507_v37  ;;  %v4251_v27 = vmul.f32 %v4248_v10, %v4243_v25 }
0x17bf   : > { %v5724_v29 = vpop.eup %5723  ;;  %5426 = vmatmul.mubr.msk.f32.vlgmr.msra.gmra.mrb[52].mxu1 %vm546_vm4, %v6509_v51 }
0x17c0   : > { %v6515_v31 = vadd.f32 %v4256_v14, %v4251_v27  ;;  %v4244_v50 = vmul.f32 %v5724_v29, %v4212_v49  ;;  %5582 = vmatpush3.bf16.msra.mxu0 %v5579_v38 }
0x17c1   : > { %5584 = vmatprep.subr.bf16.mxu0 %v5583_v40 }
0x17c2   : > { %5428 = vmatprep.mubr.msk.f32.mxu1 %vm546_vm4, %v6515_v31  ;;  %v4252_v28 = vmul.f32 %v4248_v10, %v4244_v50 }
0x17c4   : > { %v6519_v19 = vadd.f32 %v4256_v14, %v4252_v28  ;;  %5586 = vmatpush3.bf16.msra.mxu0 %v5583_v40 }
0x17c6   : > { %5429 = vmatmul.mubr.msk.f32.gmra.mrb[54].mxu1 %vm546_vm4, %v6519_v19 }
0x17c7   : > { %5461 = vmatprep.mubr.msk.f32.mxu1 %vm5755_vm5, %v5754_v45 }
0x1892   : > { %v5427_v56 = vpop.f32.mrb[52].mxu1 }
0x1893   : > { %v4349_v54 = vadd.f32 %v5427_v56, %v4264_v53  ;;  %v4343_v49 = vpop.f32.mrb[53].mxu1 }
0x1894   : > { %v4344_v55 = vadd.f32 %v4343_v49, %v4264_v53 }
0x1895   : > { %v4363_v58 = vmul.f32 %v4349_v54, %v4349_v54 }
0x1896   : > { %v4362_v59 = vmul.f32 %v4344_v55, %v4344_v55 }
0x1897   : > { %v4367_v3 = vmul.f32 %v4363_v58, %v4349_v54 }
0x1898   : > { %v4366_v41 = vmul.f32 %v4362_v59, %v4344_v55 }
0x1899   : > { %v4371_v60 = vmul.f32 0.044715, %v4367_v3  ;;  %v5430_v11 = vpop.f32.mrb[54].mxu1 }
0x189a   : > { %v4370_v44 = vmul.f32 0.044715, %v4366_v41  ;;  %v4359_v20 = vadd.f32 %v5430_v11, %v4264_v53  ;;  %v4353_v61 = vpop.f32.mrb[55].mxu1 }
0x189b   : > { %v4375_v62 = vadd.f32 %v4371_v60, %v4349_v54  ;;  %v4354_v0 = vadd.f32 %v4353_v61, %v4264_v53 }
0x189c   : > { %v4374_v2 = vadd.f32 %v4370_v44, %v4344_v55  ;;  %v4365_v4 = vmul.f32 %v4359_v20, %v4359_v20 }
0x189d   : > { %v4379_v5 = vmul.f32 0.7978846, %v4375_v62  ;;  %v4364_v6 = vmul.f32 %v4354_v0, %v4354_v0 }
0x189e   : > { %v4378_v1 = vmul.f32 0.7978846, %v4374_v2  ;;  %v4369_v8 = vmul.f32 %v4365_v4, %v4359_v20 }
0x189f   : > { %5725 = vtanh.f32 %v4379_v5  ;;  %v4368_v30 = vmul.f32 %v4364_v6, %v4354_v0 }
0x18a0   : > { %5727 = vtanh.f32 %v4378_v1  ;;  %v4373_v9 = vmul.f32 0.044715, %v4369_v8 }
0x18a1   : > { %v4372_v15 = vmul.f32 0.044715, %v4368_v30 }
0x18a2   : > { %v4377_v33 = vadd.f32 %v4373_v9, %v4359_v20 }
0x18a3   : > { %v4376_v10 = vadd.f32 %v4372_v15, %v4354_v0  ;;  %v4571_v15 = vld [vmem:[%s6623_s9] sm:$0xff] }
0x18a4   : > { %v4381_v17 = vmul.f32 0.7978846, %v4377_v33  ;;  %v4572_v33 = vld [vmem:[%s6623_s9 + $0x8] sm:$0xff] }
0x18a5   : > { %v4380_v12 = vmul.f32 0.7978846, %v4376_v10  ;;  %v5588_v10 = vpack.c.bf16 %v4572_v33, %v4571_v15 }
0x18a6   : > { %5729 = vtanh.f32 %v4381_v17  ;;  %v5762_v17 = vmov 0.0|0.0  }
0x18a7   : > { %5731 = vtanh.f32 %v4380_v12  ;;  %5587 = vmatprep.subr.bf16.mxu1 %v5762_v17  ;;  %v4573_v12 = vld [vmem:[%s6623_s9 + $0x10] sm:$0xff] }
0x18a8   : > { %5589 = vmatpush3.bf16.msra.mxu1 %v5588_v10 }
0x18a9   : > { %v5726_v13 = vpop.eup %5725  ;;  %5590 = vmatprep.subr.bf16.mxu1 %v5762_v17 }
0x18aa   : > { %v5728_v47 = vpop.eup %5727  ;;  %v4387_v14 = vadd.f32 1.0, %v5726_v13  ;;  %v4574_v13 = vld [vmem:[%s6623_s9 + $0x18] sm:$0xff] }
0x18ab   : > { %v4386_v16 = vadd.f32 1.0, %v5728_v47  ;;  %v5591_v47 = vpack.c.bf16 %v4574_v13, %v4573_v12 }
0x18ac   : > { %v4391_v21 = vmul.f32 0.5, %v4387_v14 }
0x18ad   : > { %v4390_v22 = vmul.f32 0.5, %v4386_v16  ;;  %5592 = vmatpush3.bf16.msra.mxu1 %v5591_v47 }
0x18ae   : > { %v4395_v29 = vmul.f32 %v4391_v21, %v4349_v54  ;;  %5593 = vmatprep.subr.bf16.mxu1 %v5762_v17 }
0x18af   : > { %v4394_v25 = vmul.f32 %v4390_v22, %v4344_v55 }
0x18b0   : > { %v5730_v27 = vpop.eup %5729 }
0x18b1   : > { %v5732_v50 = vpop.eup %5731  ;;  %5447 = vmatprep.mubr.msk.f32.mxu0 %vm2441_vm8, %v4394_v25  ;;  %v4389_v28 = vadd.f32 1.0, %v5730_v27 }
0x18b2   : > { %5448 = vmatmul.mubr.msk.f32.vlgmr.msra.gmra.mrb[40].mxu0 %vm2441_vm8, %v4395_v29  ;;  %v4388_v57 = vadd.f32 1.0, %v5732_v50 }
0x18b3   : > { %v4393_v52 = vmul.f32 0.5, %v4389_v28 }
0x18b4   : > { %v4392_v43 = vmul.f32 0.5, %v4388_v57 }
0x18b5   : > { %v4397_v35 = vmul.f32 %v4393_v52, %v4359_v20 }
0x18b6   : > { %v4396_v42 = vmul.f32 %v4392_v43, %v4354_v0 }
0x18b8   : > { %5450 = vmatprep.mubr.msk.f32.mxu0 %vm2441_vm8, %v4396_v42 }
0x18b9   : > { %5451 = vmatmul.mubr.msk.f32.gmra.mrb[42].mxu0 %vm2441_vm8, %v4397_v35  ;;  %v409_v35 = vld [vmem:[%s6618_s4 + $0x10] sm:$0xff] }
0x1985   : > { %v5449_v39 = vpop.f32.mrb[40].mxu0 }
0x1986   : > { %v4486_v48 = vadd.f32 %v5449_v39, %v4401_v32  ;;  %v4480_v38 = vpop.f32.mrb[41].mxu0  ;;  %v4558_v39 = vrot.slane %v409_v35, %v5914_v23 }
0x1987   : > { %v4481_v24 = vadd.f32 %v4480_v38, %v4401_v32 }
0x1988   : > { %v4500_v36 = vadd.f32 %v4486_v48, %v6509_v51 }
0x1989   : > { %v4499_v40 = vadd.f32 %v4481_v24, %v6507_v37 }
0x198a   : > { %v4506_v53 = vsel %vm546_vm4, %v4500_v36, 0.0 }
0x198b   : > { %4507 = vadd.xlane.f32.xlu1 %v4506_v53  ;;  %v4503_v58 = vsel %vm546_vm4, %v4499_v40, 0.0 }
0x198c   : > { %v5452_v56 = vpop.f32.mrb[42].mxu0 }
0x198d   : > { %v4490_v54 = vpop.f32.mrb[43].mxu0  ;;  %v4496_v49 = vadd.f32 %v5452_v56, %v4401_v32 }
0x198e   : > { %v4491_v55 = vadd.f32 %v4490_v54, %v4401_v32 }
0x198f   : > { %4504 = vadd.xlane.f32.xlu1 %v4503_v58  ;;  %v4502_v7 = vadd.f32 %v4496_v49, %v6519_v19 }
0x1990   : > { %v4501_v63 = vadd.f32 %v4491_v55, %v6515_v31 }
0x1991   : > { %v4512_v51 = vsel %vm546_vm4, %v4502_v7, 0.0 }
0x1992   : > { %v4509_v59 = vsel %vm546_vm4, %v4501_v63, 0.0 }
0x1993   : > { %4510 = vadd.xlane.f32.xlu0 %v4509_v59 }
0x1997   : > { %4513 = vadd.xlane.f32.xlu0 %v4512_v51 }
0x1a18   : > { %v4508_v37 = vpop.xlane.xlu1 %4507 }
0x1a19   : > { %v4516_v3 = vmul.f32 0.03125, %v4508_v37 }
0x1a1b   : > { %v4520_v41 = vsub.f32 %v4500_v36, %v4516_v3  ;;  %v4566_v36 = vrot.slane %v409_v35, %v5922_v26 }
0x1a1c   : > { %v4505_v60 = vpop.xlane.xlu1 %4504 }
0x1a1d   : > { %v4515_v11 = vmul.f32 0.03125, %v4505_v60  ;;  %v4524_v44 = vmul.f32 %v4520_v41, %v4520_v41 }
0x1a1f   : > { %v4519_v20 = vsub.f32 %v4499_v40, %v4515_v11  ;;  %v4530_v61 = vsel %vm546_vm4, %v4524_v44, 0.0  ;;  %v4665_v11 = vld [vmem:[%s6624_s10] sm:$0xff]  ;;  %v4666_v44 = vld [vmem:[%s6624_s10 + $0x8] sm:$0xff] }
0x1a20   : > { %4531 = vadd.xlane.f32.xlu1 %v4530_v61  ;;  %v4511_v62 = vpop.xlane.xlu0 %4510  ;;  %v5594_v61 = vpack.c.bf16 %v4666_v44, %v4665_v11 }
0x1a21   : > { %v4517_v31 = vmul.f32 0.03125, %v4511_v62  ;;  %v4523_v0 = vmul.f32 %v4519_v20, %v4519_v20  ;;  %v4668_v62 = vld [vmem:[%s6624_s10 + $0x18] sm:$0xff] }
0x1a23   : > { %v4521_v19 = vsub.f32 %v4501_v63, %v4517_v31  ;;  %v4527_v2 = vsel %vm546_vm4, %v4523_v0, 0.0 }
0x1a24   : > { %4528 = vadd.xlane.f32.xlu1 %v4527_v2  ;;  %v4514_v4 = vpop.xlane.xlu0 %4513 }
0x1a25   : > { %v4518_v5 = vmul.f32 0.03125, %v4514_v4  ;;  %v4525_v6 = vmul.f32 %v4521_v19, %v4521_v19 }
0x1a27   : > { %v4522_v1 = vsub.f32 %v4502_v7, %v4518_v5  ;;  %v4533_v8 = vsel %vm546_vm4, %v4525_v6, 0.0  ;;  %v5763_v5 = vmov 1966171168  }
0x1a28   : > { %4534 = vadd.xlane.f32.xlu0 %v4533_v8  ;;  %v4748_v6 = vunpack.c.l.s4 %v5763_v5  ;;  %v4672_v8 = vrot.slane %v409_v35, %v6150_v34 }
0x1a29   : > { %v4526_v30 = vmul.f32 %v4522_v1, %v4522_v1 }
0x1a2b   : > { %v4536_v9 = vsel %vm546_vm4, %v4526_v30, 0.0 }
0x1a2c   : > { %4537 = vadd.xlane.f32.xlu0 %v4536_v9 }
0x1aad   : > { %v4532_v14 = vpop.xlane.xlu1 %4531 }
0x1aae   : > { %v4540_v16 = vmul.f32 0.03125, %v4532_v14 }
0x1ab0   : > { %v4544_v21 = vadd.f32 1e-12, %v4540_v16 }
0x1ab1   : > { %v4529_v22 = vpop.xlane.xlu1 %4528 }
0x1ab2   : > { %v4539_v25 = vmul.f32 0.03125, %v4529_v22  ;;  %5733 = vrsqrt.f32 %v4544_v21 }
0x1ab4   : > { %v4543_v27 = vadd.f32 1e-12, %v4539_v25 }
0x1ab5   : > { %v4535_v29 = vpop.xlane.xlu0 %4534 }
0x1ab6   : > { %5735 = vrsqrt.f32 %v4543_v27  ;;  %v4541_v50 = vmul.f32 0.03125, %v4535_v29 }
0x1ab8   : > { %v4545_v28 = vadd.f32 1e-12, %v4541_v50 }
0x1ab9   : > { %v4538_v57 = vpop.xlane.xlu0 %4537 }
0x1aba   : > { %5737 = vrsqrt.f32 %v4545_v28  ;;  %v4542_v52 = vmul.f32 0.03125, %v4538_v57 }
0x1abc   : > { %v4546_v43 = vadd.f32 1e-12, %v4542_v52  ;;  %v5734_v42 = vpop.eup %5733 }
0x1abd   : > { %v4552_v48 = vmul.f32 %v5734_v42, %v4520_v41 }
0x1abe   : > { %5739 = vrsqrt.f32 %v4546_v43 }
0x1abf   : > { %v4560_v40 = vmul.f32 %v4558_v39, %v4552_v48 }
0x1ac0   : > { %v5736_v32 = vpop.eup %5735 }
0x1ac1   : > { %v4551_v38 = vmul.f32 %v5736_v32, %v4519_v20  ;;  %v4568_v55 = vadd.f32 %v4566_v36, %v4560_v40  ;;  %v4667_v20 = vld [vmem:[%s6624_s10 + $0x10] sm:$0xff] }
0x1ac2   : > { %v5597_v31 = vpack.c.bf16 %v4668_v62, %v4667_v20 }
0x1ac3   : > { %v4559_v56 = vmul.f32 %v4558_v39, %v4551_v38  ;;  %v4583_v37 = vrot.slane %v4568_v55, 7 }
0x1ac4   : > { %v5738_v24 = vpop.eup %5737 }
0x1ac5   : > { %v4553_v53 = vmul.f32 %v5738_v24, %v4521_v19  ;;  %v4567_v7 = vadd.f32 %v4566_v36, %v4559_v56 }
0x1ac7   : > { %v4561_v54 = vmul.f32 %v4558_v39, %v4553_v53  ;;  %v4585_v23 = vsel %vm4584_vm9, %v4583_v37, %v4567_v7 }
0x1ac8   : > { %v5740_v49 = vpop.eup %5739 }
0x1ac9   : > { %v4554_v58 = vmul.f32 %v5740_v49, %v4522_v1  ;;  %v4569_v63 = vadd.f32 %v4566_v36, %v4561_v54  ;;  %v4749_v1 = vunpack.c.0.s8 %v4748_v6 }
0x1acb   : > { %v4562_v59 = vmul.f32 %v4558_v39, %v4554_v58  ;;  %v4586_v51 = vrot.slane %v4569_v63, 6  ;;  %v4752_v30 = vsub.s32 %v4749_v1, %v5911_v18 }
0x1acd   : > { %v4570_v3 = vadd.f32 %v4566_v36, %v4562_v59  ;;  %v4588_v60 = vsel %vm4587_vm10, %v4586_v51, %v4585_v23 }
0x1acf   : > { %v4589_v41 = vrot.slane %v4570_v3, 5 }
0x1ad1   : > { %v4591_v26 = vsel %vm4590_vm11, %v4589_v41, %v4588_v60 }
0x1ad2   : > { %5462 = vmatmul.mubr.msk.f32.vlgmr.msra.gmra.mrb[56].mxu1 %vm546_vm4, %v4591_v26 }
0x1ad3   : > { %5472 = vmatprep.mubr.msk.f32.mxu1 %vm5755_vm5, %v5754_v45  ;;  %5595 = vmatpush3.bf16.msra.mxu1 %v5594_v61  ;;  %v4578_v45 = vrot.slane %v409_v35, %v5951_v46 }
0x1ad4   : > { %5596 = vmatprep.subr.bf16.mxu1 %v5762_v17 }
0x1ad7   : > { %5598 = vmatpush3.bf16.msra.mxu1 %v5597_v31 }
0x1ba5   : > { %v4660_v0 = vpop.f32.mrb[56].mxu1 }
0x1ba6   : > { %v4661_v19 = vadd.f32 %v4660_v0, %v4578_v45  ;;  %v5463_v2 = vpop.f32.mrb[57].mxu1 }
0x1ba8   : > { %5741 = vtanh.f32 %v4661_v19 }
0x1bb2   : > { %v5742_v4 = vpop.eup %5741 }
0x1bb3   : > { %5473 = vmatmul.mubr.msk.f32.vlgmr.msra.gmra.mrb[58].mxu1 %vm546_vm4, %v5742_v4 }
0x1c86   : > { %v4742_v9 = vpop.f32.mrb[58].mxu1 }
0x1c87   : > { %v4743_v15 = vadd.f32 %v4742_v9, %v4672_v8  ;;  %v5474_v33 = vpop.f32.mrb[59].mxu1 }
0x1c89   : > { %v4753_v46 = vrot.slane %v4743_v15, %v4752_v30 }
0x1c8b   : > { %v4754_v10 = vcombine.high %v4753_v46, %v4753_v46  ;;  %v4761_v17 = vrot.slane %v4753_v46, %v4752_v30  ;;  %4957 = vst.sshfl [vmem:[%s405_s16] sm:$0x1 pattern:$0x73625140] %v4753_v46 }
0x1c8d   : > { %v4768_v12 = vrot.slane %v4754_v10, %v4752_v30  ;;  %v4769_v13 = vcombine.high %v4761_v17, %v4761_v17  ;;  %4958 = vst.sshfl [vmem:[%s405_s16 + $0x1] sm:$0x1 pattern:$0x73625140] %v4754_v10 }
0x1c8f   : > { %v4770_v47 = vcombine.high %v4768_v12, %v4768_v12  ;;  %4777 = vst [vmem:[%s405_s16 + $0x2] sm:$0x1] %v4769_v13 }
0x1c91   : > { %4778 = vst [vmem:[%s405_s16 + $0x3] sm:$0x1] %v4770_v47 }
0x1c92 PF: > { %s21_s17 = sadd.s32 1, %s5750_s17  }
0x1c93   : > { %p18_p4 = scmp.ge.s32.totalorder %s21_s17, 4  }
0x1c95   :  { %20 = sbr.rel (!%p18_p4) target bundleno = 1 (0x1), region = 101 }

</bundles_post_ra>
